<compile_context>
chip_gen: v7x
topology: tpu7x:2x2x1
jax: 0.10.0
libtpu: 0.0.40
codegen_flags: <defaults>
</compile_context>

<pallas_src>
import functools

import jax
import jax.numpy as jnp
import numpy as np
from jax import lax
from jax.experimental import pallas as pl
from jax.experimental.pallas import tpu as pltpu


def _round_up(n, m):
    return -(-n // m) * m


# ---------------------------------------------------------------------------
# Fused kernel: conv1 -> pool -> relu -> conv2 -> pool -> relu -> fc1 -> fc2
# ---------------------------------------------------------------------------
def _fused_cnn_kernel(x_ref, wt1_ref, wt2_ref, wf1_ref, wf2_ref, cc_ref,
                      bias_ref, out_ref, *, bb):
    f32, bf16 = jnp.float32, jnp.bfloat16

    WC = x_ref.shape[1]                 # input lanes = W * C (28)
    K = wt1_ref.shape[0] // WC          # conv kernel size (5)
    Hin = x_ref.shape[0] // bb          # input rows per image (28)
    Ho1 = Hin - K + 1                   # 24
    Hp1 = Ho1 // 2                      # 12
    PP = cc_ref.shape[2]                # pooled lane width (128)
    Ho2 = Hp1 - K + 1                   # 8
    Hp2 = Ho2 // 2                      # 4
    HIDP = wf1_ref.shape[1]             # 128
    CLSP = wf2_ref.shape[1]             # 128

    # Activations are 2-D (h*bb + image, lanes) slabs: spatial-row major,
    # image minor.  Conv row-windows are contiguous, aligned row ranges, so
    # the whole bb-image block rides in the GEMM M dimension.
    def win_concat(a, rows_out):
        # Fused-K conv lhs: the K row-shifted windows concatenated along lanes.
        return jnp.concatenate(
            [a[di * bb:(di + rows_out) * bb, :] for di in range(K)], axis=-1)

    def pool_rows(a, hp):
        # 2x2 pool, row half: max of adjacent spatial-row blocks (VPU only).
        return jnp.concatenate(
            [jnp.maximum(a[(2 * p) * bb:(2 * p + 1) * bb, :],
                         a[(2 * p + 1) * bb:(2 * p + 2) * bb, :])
             for p in range(hp)], axis=0)

    def pool_cols(t, sel_even, sel_odd):
        # 2x2 pool, column half: exact 0/1 selector matmuls in bf16.
        tb = t.astype(bf16)
        return jnp.maximum(
            jnp.dot(tb, sel_even, preferred_element_type=f32),
            jnp.dot(tb, sel_odd, preferred_element_type=f32))

    # ---- conv1 + bias -> 2x2 max-pool -> ReLU -----------------------------
    x = x_ref[...]                                             # (Hin*bb, WC) f32
    lhs1 = win_concat(x, Ho1).astype(bf16)                     # (Ho1*bb, K*WC)
    acc1 = jnp.dot(lhs1, wt1_ref[...], preferred_element_type=f32)
    acc1 = acc1 + bias_ref[0:1, :]                             # (Ho1*bb, NP)
    s1 = pool_cols(pool_rows(acc1, Hp1), cc_ref[0], cc_ref[1])
    s1 = jnp.maximum(s1, 0.0).astype(bf16)                     # (Hp1*bb, PP)

    # ---- conv2 (+ identity Dropout2d) + bias -> pool -> ReLU --------------
    lhs2 = win_concat(s1, Ho2)                                 # (Ho2*bb, K*PP)
    acc2 = jnp.dot(lhs2, wt2_ref[...], preferred_element_type=f32)
    acc2 = acc2 + bias_ref[1:2, :]                             # (Ho2*bb, NP)
    s2 = pool_cols(pool_rows(acc2, Hp2), cc_ref[2], cc_ref[3])
    s2 = jnp.maximum(s2, 0.0).astype(bf16)                     # (Hp2*bb, PP)

    # ---- fc1 + ReLU (+ identity dropout) + fc2 ----------------------------
    lhs3 = jnp.concatenate(
        [s2[h * bb:(h + 1) * bb, :] for h in range(Hp2)], axis=-1)  # (bb, Hp2*PP)
    h1 = jnp.dot(lhs3, wf1_ref[...], preferred_element_type=f32)
    h1 = jnp.maximum(h1 + bias_ref[2:3, :HIDP], 0.0).astype(bf16)
    y = jnp.dot(h1, wf2_ref[...], preferred_element_type=f32)
    out_ref[...] = y + bias_ref[3:4, :CLSP]                    # dense (bb, CLSP)


# ---------------------------------------------------------------------------
# One-time (outside jit) weight preparation.
# ---------------------------------------------------------------------------
def _toeplitz_fused(w_oihw, Win, Cin, piece_w, Npad):
    """wt[di*piece_w + (wo+dj)*Cin + c, wo*O + o] = w[o, c, di, dj]."""
    O, _, K, _ = w_oihw.shape
    Wo = Win - K + 1
    wt = np.zeros((K * piece_w, Npad), np.float32)
    for di in range(K):
        for dj in range(K):
            blk = w_oihw[:, :, di, dj].T                     # (Cin, O)
            for wo in range(Wo):
                r0 = di * piece_w + (wo + dj) * Cin
                wt[r0:r0 + Cin, wo * O:(wo + 1) * O] = blk
    return wt


def _col_selectors(Wo, O, in_pad, out_pad):
    """sel[0]: even-w lane groups, sel[1]: odd-w lane groups (exact 0/1)."""
    Wp = Wo // 2
    sel = np.zeros((2, in_pad, out_pad), np.float32)
    eye = np.eye(O, dtype=np.float32)
    for wp in range(Wp):
        sel[0, (2 * wp) * O:(2 * wp + 1) * O, wp * O:(wp + 1) * O] = eye
        sel[1, (2 * wp + 1) * O:(2 * wp + 2) * O, wp * O:(wp + 1) * O] = eye
    return sel


def prepare_params(params, num_channels, num_classes):
    w1 = np.asarray(params["w1"], np.float32)    # (O1, C, 5, 5)
    b1 = np.asarray(params["b1"], np.float32)
    w2 = np.asarray(params["w2"], np.float32)    # (O2, O1, 5, 5)
    b2 = np.asarray(params["b2"], np.float32)
    wf1 = np.asarray(params["wf1"], np.float32)  # (50, 320)
    bf1 = np.asarray(params["bf1"], np.float32)
    wf2 = np.asarray(params["wf2"], np.float32)  # (ncls, 50)
    bf2 = np.asarray(params["bf2"], np.float32)

    O1, C, K, _ = w1.shape
    O2 = w2.shape[0]
    hid, ncls = wf1.shape[0], wf2.shape[0]
    assert C == num_channels and ncls == num_classes

    # Spatial geometry implied by fc1 (320 = O2 * Hp2 * Wp2 -> 1x28x28 input).
    Hp2 = int(round(np.sqrt(wf1.shape[1] / O2)))
    Wp2 = Hp2
    assert O2 * Hp2 * Wp2 == wf1.shape[1]
    Ho2, Wo2 = 2 * Hp2, 2 * Wp2
    Hp1, Wp1 = Ho2 + K - 1, Wo2 + K - 1
    Ho1, Wo1 = 2 * Hp1, 2 * Wp1
    H, W = Ho1 + K - 1, Wo1 + K - 1

    # Lane-dense padded widths (multiples of 128).
    NP = _round_up(max(Wo1 * O1, Wo2 * O2), 128)   # conv output lanes  (256)
    PP = _round_up(max(Wp1 * O1, Wp2 * O2), 128)   # pooled lanes       (128)
    HIDP = _round_up(hid, 128)                     # fc1 hidden lanes   (128)
    CLSP = _round_up(ncls, 128)                    # fc2 output lanes   (128)

    # Fused row-Toeplitz conv weights (K row-windows concatenated along lanes).
    wt1 = _toeplitz_fused(w1, W, C, W * C, NP)     # (K*W*C, NP)
    wt2 = _toeplitz_fused(w2, Wp1, O1, PP, NP)     # (K*PP,  NP)

    # Column-pooling selectors for both stages packed into one constant.
    cc = np.concatenate([_col_selectors(Wo1, O1, NP, PP),
                         _col_selectors(Wo2, O2, NP, PP)], axis=0)  # (4, NP, PP)

    # fc1 folded to consume our (h, w*O2 + c) layout exactly like PyTorch's
    # NCHW flatten (c*Hp2*Wp2 + h*Wp2 + w); fc2 transposed + padded.
    wf1f = np.zeros((Hp2 * PP, HIDP), np.float32)
    for h in range(Hp2):
        for w in range(Wp2):
            for c2 in range(O2):
                wf1f[h * PP + w * O2 + c2, :hid] = wf1[:, c2 * Hp2 * Wp2 + h * Wp2 + w]
    wf2f = np.zeros((HIDP, CLSP), np.float32)
    wf2f[:hid, :ncls] = wf2.T

    # All four bias vectors packed into one small f32 constant.
    bias = np.zeros((8, NP), np.float32)
    bias[0, :Wo1 * O1] = np.tile(b1, Wo1)
    bias[1, :Wo2 * O2] = np.tile(b2, Wo2)
    bias[2, :hid] = bf1
    bias[3, :ncls] = bf2

    prep = dict(
        wt1=jnp.asarray(wt1, jnp.bfloat16),
        wt2=jnp.asarray(wt2, jnp.bfloat16),
        wf1=jnp.asarray(wf1f, jnp.bfloat16),
        wf2=jnp.asarray(wf2f, jnp.bfloat16),
        cc=jnp.asarray(cc, jnp.bfloat16),
        bias=jnp.asarray(bias, jnp.float32),
    )
    meta = dict(H=H, W=W, C=C, ncls=ncls)
    return prep, meta


# ---------------------------------------------------------------------------
# Forward wrapper
# ---------------------------------------------------------------------------
def _pick_bb(batch):
    """Images per grid step: multiple of 8 in [8, 64], minimizing batch padding
    while keeping >= 2 grid blocks (v7x megacore)."""
    best = None
    for cand in range(8, 65, 8):
        blocks = max(2, -(-batch // cand))
        padded = blocks * cand
        key = (padded, -cand)            # least padding, then largest bb
        if best is None or key < best[0]:
            best = (key, cand)
    return best[1]


def cnn_mnist_forward(x_nchw, prep, meta):
    B = x_nchw.shape[0]
    H, W, C = meta["H"], meta["W"], meta["C"]
    CLSP = prep["wf2"].shape[1]
    WC = W * C

    bb = _pick_bb(B)
    n_blocks = max(2, -(-B // bb))       # >= 2 so both v7x cores get work
    Bp = n_blocks * bb

    x = x_nchw.astype(jnp.float32)
    if C == 1:
        x_nhwc = x.reshape(B, H, W, 1)               # pure reshape for C == 1
    else:
        x_nhwc = jnp.transpose(x, (0, 2, 3, 1))
    if Bp != B:
        x_nhwc = jnp.pad(x_nhwc, ((0, Bp - B), (0, 0), (0, 0), (0, 0)))

    # (G, bb, H, WC) -> (G, H, bb, WC) -> (G*H*bb, WC): rows are spatial-row
    # major / image minor so conv row-windows are contiguous row ranges and
    # the whole bb-image block rides in the GEMM M dimension.
    xl = x_nhwc.reshape(Bp // bb, bb, H, WC)
    xl = jnp.transpose(xl, (0, 2, 1, 3)).reshape(Bp * H, WC)

    out = pl.pallas_call(
        functools.partial(_fused_cnn_kernel, bb=bb),
        out_shape=jax.ShapeDtypeStruct((Bp, CLSP), jnp.float32),
        grid=(n_blocks,),
        in_specs=[
            pl.BlockSpec((H * bb, WC), lambda g: (g, 0)),
            pl.BlockSpec(prep["wt1"].shape, lambda g: (0, 0)),
            pl.BlockSpec(prep["wt2"].shape, lambda g: (0, 0)),
            pl.BlockSpec(prep["wf1"].shape, lambda g: (0, 0)),
            pl.BlockSpec(prep["wf2"].shape, lambda g: (0, 0)),
            pl.BlockSpec(prep["cc"].shape, lambda g: (0, 0, 0)),
            pl.BlockSpec(prep["bias"].shape, lambda g: (0, 0)),
        ],
        out_specs=pl.BlockSpec((bb, CLSP), lambda g: (g, 0)),
        compiler_params=pltpu.CompilerParams(dimension_semantics=("parallel",)),
    )(xl, prep["wt1"], prep["wt2"], prep["wf1"], prep["wf2"],
      prep["cc"], prep["bias"])

    return out[:B, :meta["ncls"]]


# ---------------------------------------------------------------------------
# Pure-JAX reference (mirrors the PyTorch graph exactly, NCHW, f32)
# ---------------------------------------------------------------------------
def reference_forward(x_nchw, p):
    dn = ("NCHW", "OIHW", "NCHW")
    y = lax.conv_general_dilated(x_nchw, p["w1"], (1, 1), "VALID",
                                 dimension_numbers=dn) + p["b1"][None, :, None, None]
    y = lax.reduce_window(y, -jnp.inf, lax.max, (1, 1, 2, 2), (1, 1, 2, 2), "VALID")
    y = jnp.maximum(y, 0.0)
    y = lax.conv_general_dilated(y, p["w2"], (1, 1), "VALID",
                                 dimension_numbers=dn) + p["b2"][None, :, None, None]
    y = lax.reduce_window(y, -jnp.inf, lax.max, (1, 1, 2, 2), (1, 1, 2, 2), "VALID")
    y = jnp.maximum(y, 0.0)
    y = y.reshape(y.shape[0], -1)
    y = jnp.maximum(y @ p["wf1"].T + p["bf1"], 0.0)
    return y @ p["wf2"].T + p["bf2"]


if __name__ == "__main__":
    key = jax.random.PRNGKey(0)
    ks = jax.random.split(key, 9)

    def u(k, shape, fan_in):
        bound = 1.0 / np.sqrt(fan_in)
        return jax.random.uniform(k, shape, jnp.float32, -bound, bound)

    # args.num_channels = 1, args.num_classes = 10 (fc1=320 forces 1x28x28 input).
    num_channels, num_classes = 1, 10
    params = {
        "w1": u(ks[0], (10, num_channels, 5, 5), num_channels * 25),
        "b1": u(ks[1], (10,), num_channels * 25),
        "w2": u(ks[2], (20, 10, 5, 5), 10 * 25),
        "b2": u(ks[3], (20,), 10 * 25),
        "wf1": u(ks[4], (50, 320), 320),
        "bf1": u(ks[5], (50,), 320),
        "wf2": u(ks[6], (num_classes, 50), 50),
        "bf2": u(ks[7], (num_classes,), 50),
    }
    x = jax.random.normal(ks[8], (16, num_channels, 28, 28), jnp.float32)

    prep, meta = prepare_params(params, num_channels, num_classes)
    fwd = jax.jit(functools.partial(cnn_mnist_forward, meta=meta))
    out = jax.block_until_ready(fwd(x, prep))

    ref = reference_forward(x, params)
    np.testing.assert_allclose(np.asarray(out), np.asarray(ref), rtol=2e-2, atol=2e-2)
    assert out.shape == (16, num_classes)
    print("KERNEL_OK")
</pallas_src>

<mosaic_0001>
module attributes {stable_mosaic.version = 11 : i64} {
  func.func @_fused_cnn_kernel(%arg0: i32, %arg1: memref<224x28xf32, #tpu.memory_space<vmem>>, %arg2: memref<140x256xbf16, #tpu.memory_space<vmem>>, %arg3: memref<640x256xbf16, #tpu.memory_space<vmem>>, %arg4: memref<512x128xbf16, #tpu.memory_space<vmem>>, %arg5: memref<128x128xbf16, #tpu.memory_space<vmem>>, %arg6: memref<4x256x128xbf16, #tpu.memory_space<vmem>>, %arg7: memref<8x256xf32, #tpu.memory_space<vmem>>, %arg8: memref<8x128xf32, #tpu.memory_space<vmem>>) attributes {dimension_semantics = [#tpu.dimension_semantics<parallel>], iteration_bounds = array<i64: 2>, scalar_prefetch = 0 : i64, scratch_operands = 0 : i64, tpu.core_type = #tpu.core_type<tc>, window_params = [{transform_indices = @transform_0, window_bounds = array<i64: 224, 28>}, {pipeline_mode = #tpu.pipeline_mode<synchronous>, transform_indices = @transform_1, window_bounds = array<i64: 140, 256>}, {pipeline_mode = #tpu.pipeline_mode<synchronous>, transform_indices = @transform_2, window_bounds = array<i64: 640, 256>}, {pipeline_mode = #tpu.pipeline_mode<synchronous>, transform_indices = @transform_3, window_bounds = array<i64: 512, 128>}, {pipeline_mode = #tpu.pipeline_mode<synchronous>, transform_indices = @transform_4, window_bounds = array<i64: 128, 128>}, {pipeline_mode = #tpu.pipeline_mode<synchronous>, transform_indices = @transform_5, window_bounds = array<i64: 4, 256, 128>}, {pipeline_mode = #tpu.pipeline_mode<synchronous>, transform_indices = @transform_6, window_bounds = array<i64: 8, 256>}, {transform_indices = @transform_7, window_bounds = array<i64: 8, 128>}]} {
    %c0 = arith.constant 0 : index
    %c0_0 = arith.constant 0 : index
    %0 = vector.load %arg1[%c0, %c0_0] : memref<224x28xf32, #tpu.memory_space<vmem>>, vector<224x28xf32>
    %1 = vector.extract_strided_slice %0 {offsets = [0, 0], sizes = [192, 28], strides = [1, 1]} : vector<224x28xf32> to vector<192x28xf32>
    %2 = vector.extract_strided_slice %0 {offsets = [8, 0], sizes = [192, 28], strides = [1, 1]} : vector<224x28xf32> to vector<192x28xf32>
    %3 = vector.extract_strided_slice %0 {offsets = [16, 0], sizes = [192, 28], strides = [1, 1]} : vector<224x28xf32> to vector<192x28xf32>
    %4 = vector.extract_strided_slice %0 {offsets = [24, 0], sizes = [192, 28], strides = [1, 1]} : vector<224x28xf32> to vector<192x28xf32>
    %5 = vector.extract_strided_slice %0 {offsets = [32, 0], sizes = [192, 28], strides = [1, 1]} : vector<224x28xf32> to vector<192x28xf32>
    %6 = tpu.concatenate %1, %2, %3, %4, %5 in 1 : vector<192x28xf32>, vector<192x28xf32>, vector<192x28xf32>, vector<192x28xf32>, vector<192x28xf32> -> vector<192x140xf32>
    %7 = arith.truncf %6 : vector<192x140xf32> to vector<192x140xbf16>
    %c0_1 = arith.constant 0 : index
    %c0_2 = arith.constant 0 : index
    %8 = vector.load %arg2[%c0_1, %c0_2] : memref<140x256xbf16, #tpu.memory_space<vmem>>, vector<140x256xbf16>
    %cst = arith.constant dense<0.000000e+00> : vector<192x256xf32>
    %9 = tpu.matmul %7, %8, %cst {dimension_numbers = #tpu.dot_dimension_numbers<[1], [0], [0], [1], [0, 0, 1, 1], [], []>} : vector<192x140xbf16>, vector<140x256xbf16>, vector<192x256xf32> -> vector<192x256xf32>
    %c0_3 = arith.constant 0 : index
    %c0_4 = arith.constant 0 : index
    %10 = vector.load %arg7[%c0_3, %c0_4] : memref<8x256xf32, #tpu.memory_space<vmem>>, vector<1x256xf32>
    %11 = vector.broadcast %10 : vector<1x256xf32> to vector<192x256xf32>
    %12 = arith.addf %9, %11 : vector<192x256xf32>
    %13 = vector.extract_strided_slice %12 {offsets = [0, 0], sizes = [8, 256], strides = [1, 1]} : vector<192x256xf32> to vector<8x256xf32>
    %14 = vector.extract_strided_slice %12 {offsets = [8, 0], sizes = [8, 256], strides = [1, 1]} : vector<192x256xf32> to vector<8x256xf32>
    %15 = arith.maximumf %13, %14 : vector<8x256xf32>
    %16 = vector.extract_strided_slice %12 {offsets = [16, 0], sizes = [8, 256], strides = [1, 1]} : vector<192x256xf32> to vector<8x256xf32>
    %17 = vector.extract_strided_slice %12 {offsets = [24, 0], sizes = [8, 256], strides = [1, 1]} : vector<192x256xf32> to vector<8x256xf32>
    %18 = arith.maximumf %16, %17 : vector<8x256xf32>
    %19 = vector.extract_strided_slice %12 {offsets = [32, 0], sizes = [8, 256], strides = [1, 1]} : vector<192x256xf32> to vector<8x256xf32>
    %20 = vector.extract_strided_slice %12 {offsets = [40, 0], sizes = [8, 256], strides = [1, 1]} : vector<192x256xf32> to vector<8x256xf32>
    %21 = arith.maximumf %19, %20 : vector<8x256xf32>
    %22 = vector.extract_strided_slice %12 {offsets = [48, 0], sizes = [8, 256], strides = [1, 1]} : vector<192x256xf32> to vector<8x256xf32>
    %23 = vector.extract_strided_slice %12 {offsets = [56, 0], sizes = [8, 256], strides = [1, 1]} : vector<192x256xf32> to vector<8x256xf32>
    %24 = arith.maximumf %22, %23 : vector<8x256xf32>
    %25 = vector.extract_strided_slice %12 {offsets = [64, 0], sizes = [8, 256], strides = [1, 1]} : vector<192x256xf32> to vector<8x256xf32>
    %26 = vector.extract_strided_slice %12 {offsets = [72, 0], sizes = [8, 256], strides = [1, 1]} : vector<192x256xf32> to vector<8x256xf32>
    %27 = arith.maximumf %25, %26 : vector<8x256xf32>
    %28 = vector.extract_strided_slice %12 {offsets = [80, 0], sizes = [8, 256], strides = [1, 1]} : vector<192x256xf32> to vector<8x256xf32>
    %29 = vector.extract_strided_slice %12 {offsets = [88, 0], sizes = [8, 256], strides = [1, 1]} : vector<192x256xf32> to vector<8x256xf32>
    %30 = arith.maximumf %28, %29 : vector<8x256xf32>
    %31 = vector.extract_strided_slice %12 {offsets = [96, 0], sizes = [8, 256], strides = [1, 1]} : vector<192x256xf32> to vector<8x256xf32>
    %32 = vector.extract_strided_slice %12 {offsets = [104, 0], sizes = [8, 256], strides = [1, 1]} : vector<192x256xf32> to vector<8x256xf32>
    %33 = arith.maximumf %31, %32 : vector<8x256xf32>
    %34 = vector.extract_strided_slice %12 {offsets = [112, 0], sizes = [8, 256], strides = [1, 1]} : vector<192x256xf32> to vector<8x256xf32>
    %35 = vector.extract_strided_slice %12 {offsets = [120, 0], sizes = [8, 256], strides = [1, 1]} : vector<192x256xf32> to vector<8x256xf32>
    %36 = arith.maximumf %34, %35 : vector<8x256xf32>
    %37 = vector.extract_strided_slice %12 {offsets = [128, 0], sizes = [8, 256], strides = [1, 1]} : vector<192x256xf32> to vector<8x256xf32>
    %38 = vector.extract_strided_slice %12 {offsets = [136, 0], sizes = [8, 256], strides = [1, 1]} : vector<192x256xf32> to vector<8x256xf32>
    %39 = arith.maximumf %37, %38 : vector<8x256xf32>
    %40 = vector.extract_strided_slice %12 {offsets = [144, 0], sizes = [8, 256], strides = [1, 1]} : vector<192x256xf32> to vector<8x256xf32>
    %41 = vector.extract_strided_slice %12 {offsets = [152, 0], sizes = [8, 256], strides = [1, 1]} : vector<192x256xf32> to vector<8x256xf32>
    %42 = arith.maximumf %40, %41 : vector<8x256xf32>
    %43 = vector.extract_strided_slice %12 {offsets = [160, 0], sizes = [8, 256], strides = [1, 1]} : vector<192x256xf32> to vector<8x256xf32>
    %44 = vector.extract_strided_slice %12 {offsets = [168, 0], sizes = [8, 256], strides = [1, 1]} : vector<192x256xf32> to vector<8x256xf32>
    %45 = arith.maximumf %43, %44 : vector<8x256xf32>
    %46 = vector.extract_strided_slice %12 {offsets = [176, 0], sizes = [8, 256], strides = [1, 1]} : vector<192x256xf32> to vector<8x256xf32>
    %47 = vector.extract_strided_slice %12 {offsets = [184, 0], sizes = [8, 256], strides = [1, 1]} : vector<192x256xf32> to vector<8x256xf32>
    %48 = arith.maximumf %46, %47 : vector<8x256xf32>
    %49 = tpu.concatenate %15, %18, %21, %24, %27, %30, %33, %36, %39, %42, %45, %48 in 0 : vector<8x256xf32>, vector<8x256xf32>, vector<8x256xf32>, vector<8x256xf32>, vector<8x256xf32>, vector<8x256xf32>, vector<8x256xf32>, vector<8x256xf32>, vector<8x256xf32>, vector<8x256xf32>, vector<8x256xf32>, vector<8x256xf32> -> vector<96x256xf32>
    %c0_5 = arith.constant 0 : index
    %c0_6 = arith.constant 0 : index
    %c0_7 = arith.constant 0 : index
    %50 = vector.load %arg6[%c0_5, %c0_6, %c0_7] : memref<4x256x128xbf16, #tpu.memory_space<vmem>>, vector<1x256x128xbf16>
    %51 = vector.shape_cast %50 : vector<1x256x128xbf16> to vector<256x128xbf16>
    %c1 = arith.constant 1 : index
    %c0_8 = arith.constant 0 : index
    %c0_9 = arith.constant 0 : index
    %52 = vector.load %arg6[%c1, %c0_8, %c0_9] : memref<4x256x128xbf16, #tpu.memory_space<vmem>>, vector<1x256x128xbf16>
    %53 = vector.shape_cast %52 : vector<1x256x128xbf16> to vector<256x128xbf16>
    %54 = arith.truncf %49 : vector<96x256xf32> to vector<96x256xbf16>
    %cst_10 = arith.constant dense<0.000000e+00> : vector<96x128xf32>
    %55 = tpu.matmul %54, %51, %cst_10 {dimension_numbers = #tpu.dot_dimension_numbers<[1], [0], [0], [1], [0, 0, 1, 1], [], []>} : vector<96x256xbf16>, vector<256x128xbf16>, vector<96x128xf32> -> vector<96x128xf32>
    %cst_11 = arith.constant dense<0.000000e+00> : vector<96x128xf32>
    %56 = tpu.matmul %54, %53, %cst_11 {dimension_numbers = #tpu.dot_dimension_numbers<[1], [0], [0], [1], [0, 0, 1, 1], [], []>} : vector<96x256xbf16>, vector<256x128xbf16>, vector<96x128xf32> -> vector<96x128xf32>
    %57 = arith.maximumf %55, %56 : vector<96x128xf32>
    %cst_12 = arith.constant 0.000000e+00 : f32
    %58 = vector.broadcast %cst_12 : f32 to vector<96x128xf32>
    %59 = arith.maximumf %57, %58 : vector<96x128xf32>
    %60 = arith.truncf %59 : vector<96x128xf32> to vector<96x128xbf16>
    %61 = vector.extract_strided_slice %60 {offsets = [0, 0], sizes = [64, 128], strides = [1, 1]} : vector<96x128xbf16> to vector<64x128xbf16>
    %62 = vector.extract_strided_slice %60 {offsets = [8, 0], sizes = [64, 128], strides = [1, 1]} : vector<96x128xbf16> to vector<64x128xbf16>
    %63 = vector.extract_strided_slice %60 {offsets = [16, 0], sizes = [64, 128], strides = [1, 1]} : vector<96x128xbf16> to vector<64x128xbf16>
    %64 = vector.extract_strided_slice %60 {offsets = [24, 0], sizes = [64, 128], strides = [1, 1]} : vector<96x128xbf16> to vector<64x128xbf16>
    %65 = vector.extract_strided_slice %60 {offsets = [32, 0], sizes = [64, 128], strides = [1, 1]} : vector<96x128xbf16> to vector<64x128xbf16>
    %66 = tpu.concatenate %61, %62, %63, %64, %65 in 1 : vector<64x128xbf16>, vector<64x128xbf16>, vector<64x128xbf16>, vector<64x128xbf16>, vector<64x128xbf16> -> vector<64x640xbf16>
    %c0_13 = arith.constant 0 : index
    %c0_14 = arith.constant 0 : index
    %67 = vector.load %arg3[%c0_13, %c0_14] : memref<640x256xbf16, #tpu.memory_space<vmem>>, vector<640x256xbf16>
    %cst_15 = arith.constant dense<0.000000e+00> : vector<64x256xf32>
    %68 = tpu.matmul %66, %67, %cst_15 {dimension_numbers = #tpu.dot_dimension_numbers<[1], [0], [0], [1], [0, 0, 1, 1], [], []>} : vector<64x640xbf16>, vector<640x256xbf16>, vector<64x256xf32> -> vector<64x256xf32>
    %c1_16 = arith.constant 1 : index
    %c0_17 = arith.constant 0 : index
    %69 = vector.load %arg7[%c1_16, %c0_17] : memref<8x256xf32, #tpu.memory_space<vmem>>, vector<1x256xf32>
    %70 = vector.broadcast %69 : vector<1x256xf32> to vector<64x256xf32>
    %71 = arith.addf %68, %70 : vector<64x256xf32>
    %72 = vector.extract_strided_slice %71 {offsets = [0, 0], sizes = [8, 256], strides = [1, 1]} : vector<64x256xf32> to vector<8x256xf32>
    %73 = vector.extract_strided_slice %71 {offsets = [8, 0], sizes = [8, 256], strides = [1, 1]} : vector<64x256xf32> to vector<8x256xf32>
    %74 = arith.maximumf %72, %73 : vector<8x256xf32>
    %75 = vector.extract_strided_slice %71 {offsets = [16, 0], sizes = [8, 256], strides = [1, 1]} : vector<64x256xf32> to vector<8x256xf32>
    %76 = vector.extract_strided_slice %71 {offsets = [24, 0], sizes = [8, 256], strides = [1, 1]} : vector<64x256xf32> to vector<8x256xf32>
    %77 = arith.maximumf %75, %76 : vector<8x256xf32>
    %78 = vector.extract_strided_slice %71 {offsets = [32, 0], sizes = [8, 256], strides = [1, 1]} : vector<64x256xf32> to vector<8x256xf32>
    %79 = vector.extract_strided_slice %71 {offsets = [40, 0], sizes = [8, 256], strides = [1, 1]} : vector<64x256xf32> to vector<8x256xf32>
    %80 = arith.maximumf %78, %79 : vector<8x256xf32>
    %81 = vector.extract_strided_slice %71 {offsets = [48, 0], sizes = [8, 256], strides = [1, 1]} : vector<64x256xf32> to vector<8x256xf32>
    %82 = vector.extract_strided_slice %71 {offsets = [56, 0], sizes = [8, 256], strides = [1, 1]} : vector<64x256xf32> to vector<8x256xf32>
    %83 = arith.maximumf %81, %82 : vector<8x256xf32>
    %84 = tpu.concatenate %74, %77, %80, %83 in 0 : vector<8x256xf32>, vector<8x256xf32>, vector<8x256xf32>, vector<8x256xf32> -> vector<32x256xf32>
    %c2 = arith.constant 2 : index
    %c0_18 = arith.constant 0 : index
    %c0_19 = arith.constant 0 : index
    %85 = vector.load %arg6[%c2, %c0_18, %c0_19] : memref<4x256x128xbf16, #tpu.memory_space<vmem>>, vector<1x256x128xbf16>
    %86 = vector.shape_cast %85 : vector<1x256x128xbf16> to vector<256x128xbf16>
    %c3 = arith.constant 3 : index
    %c0_20 = arith.constant 0 : index
    %c0_21 = arith.constant 0 : index
    %87 = vector.load %arg6[%c3, %c0_20, %c0_21] : memref<4x256x128xbf16, #tpu.memory_space<vmem>>, vector<1x256x128xbf16>
    %88 = vector.shape_cast %87 : vector<1x256x128xbf16> to vector<256x128xbf16>
    %89 = arith.truncf %84 : vector<32x256xf32> to vector<32x256xbf16>
    %cst_22 = arith.constant dense<0.000000e+00> : vector<32x128xf32>
    %90 = tpu.matmul %89, %86, %cst_22 {dimension_numbers = #tpu.dot_dimension_numbers<[1], [0], [0], [1], [0, 0, 1, 1], [], []>} : vector<32x256xbf16>, vector<256x128xbf16>, vector<32x128xf32> -> vector<32x128xf32>
    %cst_23 = arith.constant dense<0.000000e+00> : vector<32x128xf32>
    %91 = tpu.matmul %89, %88, %cst_23 {dimension_numbers = #tpu.dot_dimension_numbers<[1], [0], [0], [1], [0, 0, 1, 1], [], []>} : vector<32x256xbf16>, vector<256x128xbf16>, vector<32x128xf32> -> vector<32x128xf32>
    %92 = arith.maximumf %90, %91 : vector<32x128xf32>
    %cst_24 = arith.constant 0.000000e+00 : f32
    %93 = vector.broadcast %cst_24 : f32 to vector<32x128xf32>
    %94 = arith.maximumf %92, %93 : vector<32x128xf32>
    %95 = arith.truncf %94 : vector<32x128xf32> to vector<32x128xbf16>
    %96 = vector.extract_strided_slice %95 {offsets = [0, 0], sizes = [8, 128], strides = [1, 1]} : vector<32x128xbf16> to vector<8x128xbf16>
    %97 = vector.extract_strided_slice %95 {offsets = [8, 0], sizes = [8, 128], strides = [1, 1]} : vector<32x128xbf16> to vector<8x128xbf16>
    %98 = vector.extract_strided_slice %95 {offsets = [16, 0], sizes = [8, 128], strides = [1, 1]} : vector<32x128xbf16> to vector<8x128xbf16>
    %99 = vector.extract_strided_slice %95 {offsets = [24, 0], sizes = [8, 128], strides = [1, 1]} : vector<32x128xbf16> to vector<8x128xbf16>
    %100 = tpu.concatenate %96, %97, %98, %99 in 1 : vector<8x128xbf16>, vector<8x128xbf16>, vector<8x128xbf16>, vector<8x128xbf16> -> vector<8x512xbf16>
    %c0_25 = arith.constant 0 : index
    %c0_26 = arith.constant 0 : index
    %101 = vector.load %arg4[%c0_25, %c0_26] : memref<512x128xbf16, #tpu.memory_space<vmem>>, vector<512x128xbf16>
    %cst_27 = arith.constant dense<0.000000e+00> : vector<8x128xf32>
    %102 = tpu.matmul %100, %101, %cst_27 {dimension_numbers = #tpu.dot_dimension_numbers<[1], [0], [0], [1], [0, 0, 1, 1], [], []>} : vector<8x512xbf16>, vector<512x128xbf16>, vector<8x128xf32> -> vector<8x128xf32>
    %c2_28 = arith.constant 2 : index
    %c0_29 = arith.constant 0 : index
    %103 = vector.load %arg7[%c2_28, %c0_29] : memref<8x256xf32, #tpu.memory_space<vmem>>, vector<1x128xf32>
    %104 = vector.broadcast %103 : vector<1x128xf32> to vector<8x128xf32>
    %105 = arith.addf %102, %104 : vector<8x128xf32>
    %cst_30 = arith.constant 0.000000e+00 : f32
    %106 = vector.broadcast %cst_30 : f32 to vector<8x128xf32>
    %107 = arith.maximumf %105, %106 : vector<8x128xf32>
    %108 = arith.truncf %107 : vector<8x128xf32> to vector<8x128xbf16>
    %c0_31 = arith.constant 0 : index
    %c0_32 = arith.constant 0 : index
    %109 = vector.load %arg5[%c0_31, %c0_32] : memref<128x128xbf16, #tpu.memory_space<vmem>>, vector<128x128xbf16>
    %cst_33 = arith.constant dense<0.000000e+00> : vector<8x128xf32>
    %110 = tpu.matmul %108, %109, %cst_33 {dimension_numbers = #tpu.dot_dimension_numbers<[1], [0], [0], [1], [0, 0, 1, 1], [], []>} : vector<8x128xbf16>, vector<128x128xbf16>, vector<8x128xf32> -> vector<8x128xf32>
    %c3_34 = arith.constant 3 : index
    %c0_35 = arith.constant 0 : index
    %111 = vector.load %arg7[%c3_34, %c0_35] : memref<8x256xf32, #tpu.memory_space<vmem>>, vector<1x128xf32>
    %112 = vector.broadcast %111 : vector<1x128xf32> to vector<8x128xf32>
    %113 = arith.addf %110, %112 : vector<8x128xf32>
    %c0_36 = arith.constant 0 : index
    %c0_37 = arith.constant 0 : index
    %114 = vector.load %arg8[%c0_36, %c0_37] : memref<8x128xf32, #tpu.memory_space<vmem>>, vector<8x128xf32>
    tpu.vector_store %arg8[%c0_36, %c0_37], %113 {strides = array<i32>} : memref<8x128xf32, #tpu.memory_space<vmem>>, vector<8x128xf32>,
    return
  }
  func.func @transform_0(%arg0: i32) -> (i32, i32) {
    %c0_i32 = arith.constant 0 : i32
    %c0_i32_0 = arith.constant 0 : i32
    return %arg0, %c0_i32 : i32, i32
  }
  func.func @transform_1(%arg0: i32) -> (i32, i32) {
    %c0_i32 = arith.constant 0 : i32
    %c0_i32_0 = arith.constant 0 : i32
    %c0_i32_1 = arith.constant 0 : i32
    return %c0_i32, %c0_i32_0 : i32, i32
  }
  func.func @transform_2(%arg0: i32) -> (i32, i32) {
    %c0_i32 = arith.constant 0 : i32
    %c0_i32_0 = arith.constant 0 : i32
    %c0_i32_1 = arith.constant 0 : i32
    return %c0_i32, %c0_i32_0 : i32, i32
  }
  func.func @transform_3(%arg0: i32) -> (i32, i32) {
    %c0_i32 = arith.constant 0 : i32
    %c0_i32_0 = arith.constant 0 : i32
    %c0_i32_1 = arith.constant 0 : i32
    return %c0_i32, %c0_i32_0 : i32, i32
  }
  func.func @transform_4(%arg0: i32) -> (i32, i32) {
    %c0_i32 = arith.constant 0 : i32
    %c0_i32_0 = arith.constant 0 : i32
    %c0_i32_1 = arith.constant 0 : i32
    return %c0_i32, %c0_i32_0 : i32, i32
  }
  func.func @transform_5(%arg0: i32) -> (i32, i32, i32) {
    %c0_i32 = arith.constant 0 : i32
    %c0_i32_0 = arith.constant 0 : i32
    %c0_i32_1 = arith.constant 0 : i32
    %c0_i32_2 = arith.constant 0 : i32
    return %c0_i32, %c0_i32_0, %c0_i32_1 : i32, i32, i32
  }
  func.func @transform_6(%arg0: i32) -> (i32, i32) {
    %c0_i32 = arith.constant 0 : i32
    %c0_i32_0 = arith.constant 0 : i32
    %c0_i32_1 = arith.constant 0 : i32
    return %c0_i32, %c0_i32_0 : i32, i32
  }
  func.func @transform_7(%arg0: i32) -> (i32, i32) {
    %c0_i32 = arith.constant 0 : i32
    %c0_i32_0 = arith.constant 0 : i32
    return %arg0, %c0_i32 : i32, i32
  }
}

</mosaic_0001>

<bundles_post_ra>
// kernel: cnn_mnist_forward.1
= control target key start
LH: loop header
LB: loop body
LE: loop exit
PB: predicated region body
PF: predicated region fallthrough
CT: control target
= control target key end

     0   :  { %12 = vsyncpa [#allocation3], 0  ;;  %s5588_s0 = inlined_call_operand.vmem [shape: f32[448,28], index: 0, kind: input, shape index: {}]   ;;  %s5589_s1 = inlined_call_operand.vmem [shape: bf16[140,256], index: 1, kind: input, shape index: {}]   ;;  %s5590_s2 = inlined_call_operand.vmem [shape: bf16[640,256], index: 2, kind: input, shape index: {}]   ;;  %s5591_s3 = inlined_call_operand.vmem [shape: bf16[512,128], index: 3, kind: input, shape index: {}]   ;;  %s5592_s4 = inlined_call_operand.vmem [shape: bf16[128,128], index: 4, kind: input, shape index: {}]   ;;  %s5593_s5 = inlined_call_operand.vmem [shape: bf16[4,256,128], index: 5, kind: input, shape index: {}]   ;;  %s5594_s6 = inlined_call_operand.vmem [shape: f32[8,256], index: 6, kind: input, shape index: {}]   ;;  %s5595_s7 = inlined_call_operand.hbm [shape: f32[16,128], index: 7, kind: output, shape index: {}]  }
   0x1   :  { %14 = vsyncpa [#allocation3 + $0x1], 0  ;;  %s4442_s24 = smov 0   ;;  %s4444_s25 = smov 0  }
   0x2   :  { %s4446_s26 = smov 0   ;;  %s4448_s27 = smov 0  }
   0x3 LB: > { %s4463_s28 = sadd.s32 4294967295, %s4392_s27   ;;  %s3184_s29 = sadd.s32 4294967294, %s4392_s27   ;;  %s4392_s27 = sphi %s4448_s27, %s5601_s27   ;;  %s4388_s26 = sphi %s4446_s26, %s5600_s26   ;;  %s4384_s25 = sphi %s4444_s25, %s5599_s25   ;;  %s4380_s24 = sphi %s4442_s24, %s5598_s24  }
   0x4   : > { %s4467_s30 = sadd.s32 1, %s4392_s27   ;;  %s179_s8 = sadd.s32 1, %s4388_s26 }
   0x5   : > { %s176_s9 = ssub.s32 %s4392_s27, %s4467_s30  ;;  %p189_p0 = scmp.ne.s32.totalorder %s4388_s26, %s4384_s25 }
   0x6   : > { %p177_p1 = scmp.eq.s32.totalorder %s176_s9, 0  ;;  %p190_p2 = scmp.eq.s32.totalorder %s4463_s28, 1 }
   0x7   : > { %p195_p3 = scmp.ne.s32.totalorder %s4384_s25, %s4380_s24  ;;  %p196_p4 = scmp.eq.s32.totalorder %s3184_s29, 1 }
   0x8   : > { %s4478_s10 = scalar_select %p177_p1, %s4388_s26, %s179_s8  }
   0x9   : > { %p4480_p5 = por %p190_p2, %p189_p0  ;;  %p4484_p6 = por %p196_p4, %p195_p3 }
   0xa   : > { %p3187_p7 = scmp.ge.s32.totalorder %s4392_s27, 1  ;;  %p241_p8 = scmp.lt.s32.totalorder %s4392_s27, 3 }
   0xc   : > { %p242_p9 = pnand %p3187_p7, %p241_p8 }
   0xd   : > { %s273_s13 = smul.u32 (!%p242_p9), 28, %s4463_s28  ;;  %v4073_v0 = vld [vmem:[%s5589_s1 + $0x4] ss:$8 sps:$4 sm:$0xff] (!%p242_p9)   ;;  %v4075_v1 = vld [vmem:[%s5589_s1] ss:$8 sps:$4 sm:$0xff] (!%p242_p9)   ;;  %s4394_s18 = smov (!%p242_p9), 28  }
   0xe   : > { %245 = sbr.rel (%p242_p9) target bundleno = 1771 (0x6eb), region = 48  ;;  %909 = vmatprep.subr.bf16.mxu0 (!%p242_p9), %v4073_v0  ;;  %v4076_v2 = vld [vmem:[%s5589_s1 + $0x14] ss:$8 sps:$4 sm:$0xff] (!%p242_p9)   ;;  %v4078_v3 = vld [vmem:[%s5589_s1 + $0x10] ss:$8 sps:$4 sm:$0xff] (!%p242_p9)   ;;  %s4395_s19 = smov (!%p242_p9), 84  }
   0xf   : > { %p274_p10 = scmp.lt.s32.totalorder (!%p242_p9), %s273_s13, 55  ;;  %910 = vmatpush1.bf16.msra.mxu0 (!%p242_p9), %v4075_v1  ;;  %v4079_v4 = vld [vmem:[%s5589_s1 + $0x24] ss:$8 sps:$4 sm:$0xff] (!%p242_p9)   ;;  %v4081_v11 = vld [vmem:[%s5589_s1 + $0x20] ss:$8 sps:$4 sm:$0xff] (!%p242_p9)   ;;  %s4397_s8 = smov (!%p242_p9), 112  }
  0x10   : > { %911 = vmatprep.subr.bf16.mxu0 (!%p242_p9), %v4076_v2  ;;  %v4082_v13 = vld [vmem:[%s5589_s1 + $0x34] ss:$8 sps:$4 sm:$0xff] (!%p242_p9)   ;;  %v4084_v16 = vld [vmem:[%s5589_s1 + $0x30] ss:$8 sps:$4 sm:$0xff] (!%p242_p9)   ;;  %v4085_v17 = vld [vmem:[%s5589_s1 + $0x44] ss:$8 sps:$4 sm:$0xff] (!%p242_p9)  }
  0x11   : > { %v4087_v19 = vld [vmem:[%s5589_s1 + $0x40] ss:$8 sps:$4 sm:$0xff] (!%p242_p9)   ;;  %v4088_v21 = vld [vmem:[%s5589_s1 + $0x54] ss:$8 sps:$4 sm:$0xff] (!%p242_p9)   ;;  %v4090_v24 = vld [vmem:[%s5589_s1 + $0x50] ss:$8 sps:$4 sm:$0xff] (!%p242_p9)  }
  0x12   : > { %vm902_vm0 = vcmask (!%p242_p9), 1045504   ;;  %v4091_v25 = vld [vmem:[%s5589_s1 + $0x64] ss:$8 sps:$4 sm:$0xff] (!%p242_p9)   ;;  %v4099_v26 = vld [vmem:[%s5589_s1 + $0x80] ss:$8 sps:$4 sm:$0x3f] (!%p242_p9)  }
  0x13   : > { %912 = vmatpush1.bf16.msra.mxu0 (!%p242_p9), %v4078_v3  ;;  %v4093_v29 = vld [vmem:[%s5589_s1 + $0x60] ss:$8 sps:$4 sm:$0xff] (!%p242_p9)   ;;  %v904_v30 = vsel (!%p242_p9), %vm902_vm0, %v4099_v26, 0  ;;  %v4094_v31 = vld [vmem:[%s5589_s1 + $0x74] ss:$8 sps:$4 sm:$0xff] (!%p242_p9)   ;;  %vm623_vm1 = vcmask (!%p242_p9), 228352  }
  0x14   : > { %913 = vmatprep.subr.bf16.mxu0 (!%p242_p9), %v4079_v4  ;;  %v4096_v33 = vld [vmem:[%s5589_s1 + $0x70] ss:$8 sps:$4 sm:$0xff] (!%p242_p9)   ;;  %v4097_v35 = vld [vmem:[%s5589_s1 + $0x84] ss:$8 sps:$4 sm:$0x3f] (!%p242_p9)   ;;  %vm648_vm2 = vcmask (!%p242_p9), 457728  }
  0x15   : > { %s5603_s13 = smov (!%p274_p10, %s273_s13), 55  ;;  %vm673_vm3 = vcmask 687104   ;;  %vm698_vm4 = vcmask 916480   ;;  %vm865_vm5 = vcmask 97280   ;;  %vm1552_vm6 = vcmask 1043456   ;;  %s4401_s22 = smov [#allocation2]  }
  0x16   : > { %s3189_s29 = sshll.u32 %s5603_s13, 3  ;;  %vm4400_vm7 = vmmov 0   ;;  %s270_s13 = sand.u32 1, %s4384_s25  }
  0x17   : > { %s4509_s14 = scalar_lea.vmem %s5588_s0, %s3189_s29  ;;  %914 = vmatpush1.bf16.msra.mxu0 %v4081_v11  ;;  %s4396_s29 = smov 56   ;;  %v4102_v11 = vld [vmem:[%s5593_s5 + $0x48] sm:$0xff]  }
  0x18   : > { %v4512_v5 = vld [vmem:[%s4509_s14 + $0x8] sm:$0xff]  ;;  %v4515_v6 = vld [vmem:[%s4509_s14 + $0x10] sm:$0xff]  ;;  %v4518_v7 = vld [vmem:[%s4509_s14 + $0x18] sm:$0xff]  ;;  %915 = vmatprep.subr.bf16.mxu0 %v4082_v13  ;;  %s3188_s15 = sshll.u32 %s270_s13, 3  ;;  %s3112_s21 = scalar_lea.sflag [#allocation3], %s270_s13 }
  0x19   : > { %v3833_v8 = vpack.i.bf16 %v4515_v6, %v4512_v5  ;;  %v284_v9 = vld [vmem:[%s4509_s14 + $0x20] sm:$0xff]  ;;  %v285_v10 = vld [vmem:[%s4509_s14 + $0x28] sm:$0xff]  ;;  %v3838_v14 = vpack.i.bf16 %v4518_v7, %v4515_v6  ;;  %v286_v18 = vld [vmem:[%s4509_s14 + $0x30] sm:$0xff]  ;;  %s4334_s23 = sshll.u32 %s4401_s22, 4  ;;  %s4335_s23 = int_to_ptr.vmem [resolvable:$false] %s4334_s23 }
  0x1a   : > { %v3843_v12 = vpack.i.bf16 %v284_v9, %v4518_v7  ;;  %v3848_v15 = vpack.i.bf16 %v285_v10, %v284_v9  ;;  %v287_v20 = vld [vmem:[%s4509_s14 + $0x38] sm:$0xff]  ;;  %v3863_v22 = vpack.i.bf16 %v286_v18, %v285_v10  ;;  %v288_v27 = vld [vmem:[%s4509_s14 + $0x40] sm:$0xff]  ;;  %v289_v28 = vld [vmem:[%s4509_s14 + $0x48] sm:$0xff]  ;;  %s4336_s9 = scalar_lea.vmem %s4335_s23, 256 }
  0x1b   : > { %3834 = vrot.lane.b32.xlu0 %v3833_v8, %s4394_s18  ;;  %916 = vmatpush1.bf16.msra.mxu0 %v4084_v16  ;;  %v3868_v23 = vpack.i.bf16 %v287_v20, %v286_v18  ;;  %v3883_v32 = vpack.i.bf16 %v288_v27, %v287_v20  ;;  %v3888_v34 = vpack.i.bf16 %v289_v28, %v288_v27  ;;  %v4582_v36 = vld [vmem:[%s4509_s14 + $0x50] sm:$0xff]  ;;  %v4586_v37 = vld [vmem:[%s4509_s14 + $0x58] sm:$0xff]  ;;  %v4596_v40 = vld [vmem:[%s4509_s14 + $0x60] sm:$0xff] }
  0x1c   : > { %3844 = vrot.lane.b32.xlu1 %v3843_v12, %s4395_s19  ;;  %917 = vmatprep.subr.bf16.mxu0 %v4085_v17  ;;  %v3903_v38 = vpack.i.bf16 %v4582_v36, %v289_v28  ;;  %v3908_v39 = vpack.i.bf16 %v4586_v37, %v4582_v36  ;;  %v4600_v41 = vld [vmem:[%s4509_s14 + $0x68] sm:$0xff]  ;;  %v3923_v42 = vpack.i.bf16 %v4596_v40, %v4586_v37  ;;  %v4610_v44 = vld [vmem:[%s4509_s14 + $0x70] sm:$0xff]  ;;  %v4614_v45 = vld [vmem:[%s4509_s14 + $0x78] sm:$0xff] }
  0x1d   : > { %v3928_v43 = vpack.i.bf16 %v4600_v41, %v4596_v40  ;;  %v3943_v46 = vpack.i.bf16 %v4610_v44, %v4600_v41  ;;  %v3948_v47 = vpack.i.bf16 %v4614_v45, %v4610_v44  ;;  %v4624_v48 = vld [vmem:[%s4509_s14 + $0x80] sm:$0xff]  ;;  %v4628_v49 = vld [vmem:[%s4509_s14 + $0x88] sm:$0xff]  ;;  %v4638_v52 = vld [vmem:[%s4509_s14 + $0x90] sm:$0xff] }
  0x1e   : > { %v3963_v50 = vpack.i.bf16 %v4624_v48, %v4614_v45  ;;  %v3968_v51 = vpack.i.bf16 %v4628_v49, %v4624_v48  ;;  %v4642_v53 = vld [vmem:[%s4509_s14 + $0x98] sm:$0xff]  ;;  %v3983_v54 = vpack.i.bf16 %v4638_v52, %v4628_v49  ;;  %v4652_v56 = vld [vmem:[%s4509_s14 + $0xa0] sm:$0xff]  ;;  %v4656_v57 = vld [vmem:[%s4509_s14 + $0xa8] sm:$0xff] }
  0x1f   : > { %3839 = vrot.lane.b32.xlu0 %v3838_v14, %s4396_s29  ;;  %918 = vmatpush1.bf16.msra.mxu0 %v4087_v19  ;;  %v3988_v55 = vpack.i.bf16 %v4642_v53, %v4638_v52  ;;  %v4003_v58 = vpack.i.bf16 %v4652_v56, %v4642_v53  ;;  %v4008_v59 = vpack.i.bf16 %v4656_v57, %v4652_v56  ;;  %v4666_v60 = vld [vmem:[%s4509_s14 + $0xb0] sm:$0xff]  ;;  %v4670_v61 = vld [vmem:[%s4509_s14 + $0xb8] sm:$0xff]  ;;  %v304_v0 = vld [vmem:[%s4509_s14 + $0xc0] sm:$0xff] }
  0x20   : > { %3849 = vrot.lane.b32.xlu1 %v3848_v15, %s4397_s8  ;;  %919 = vmatprep.subr.bf16.mxu0 %v4088_v21  ;;  %v4023_v62 = vpack.i.bf16 %v4666_v60, %v4656_v57  ;;  %v4028_v63 = vpack.i.bf16 %v4670_v61, %v4666_v60  ;;  %v305_v1 = vld [vmem:[%s4509_s14 + $0xc8] sm:$0xff]  ;;  %v4043_v2 = vpack.i.bf16 %v304_v0, %v4670_v61  ;;  %v306_v4 = vld [vmem:[%s4509_s14 + $0xd0] sm:$0xff]  ;;  %v307_v8 = vld [vmem:[%s4509_s14 + $0xd8] sm:$0xff] }
  0x21   : > { %v4048_v3 = vpack.i.bf16 %v305_v1, %v304_v0  ;;  %v4100_v9 = vld [vmem:[%s5593_s5 + $0x40] sm:$0xff]   ;;  %v4103_v13 = vld [vmem:[%s5593_s5 + $0x8] sm:$0xff]   ;;  %v4068_v14 = vpack.i.bf16 %v307_v8, %v306_v4  ;;  %v4105_v16 = vld [vmem:[%s5593_s5 + $0x10] sm:$0xff]  }
  0x22   : > { %v4101_v10 = vld [vmem:[%s5593_s5] sm:$0xff]   ;;  %3506 = vmatprep.subr.bf16.mxu1 %v4100_v9  ;;  %v4106_v17 = vld [vmem:[%s5593_s5 + $0x58] sm:$0xff]  }
  0x23   : > { %3854 = vrot.lane.b32.xlu0 %v3843_v12, %s4394_s18  ;;  %920 = vmatpush1.bf16.msra.mxu0 %v4090_v24  ;;  %v4063_v12 = vpack.i.bf16 %v306_v4, %v305_v1 }
  0x24   : > { %3859 = vrot.lane.b32.xlu1 %v3848_v15, %s4396_s29  ;;  %921 = vmatprep.subr.bf16.mxu0 %v4091_v25  ;;  %v4104_v15 = vld [vmem:[%s5593_s5 + $0x50] sm:$0xff]  }
  0x25   : > { %3507 = vmatpush3.bf16.msra.mxu1 %v4101_v10 }
  0x26   : > { %3508 = vmatprep.subr.bf16.mxu1 %v4102_v11 }
  0x27   : > { %3864 = vrot.lane.b32.xlu0 %v3863_v22, %s4395_s19  ;;  %922 = vmatpush1.bf16.msra.mxu0 %v4093_v29 }
  0x28   : > { %3869 = vrot.lane.b32.xlu1 %v3868_v23, %s4397_s8  ;;  %923 = vmatprep.subr.bf16.mxu0 %v4094_v31 }
  0x29   : > { %3509 = vmatpush3.bf16.msra.mxu1 %v4103_v13 }
  0x2a   : > { %3510 = vmatprep.subr.bf16.mxu1 %v4104_v15 }
  0x2b   : > { %3874 = vrot.lane.b32.xlu0 %v3863_v22, %s4394_s18  ;;  %924 = vmatpush1.bf16.msra.mxu0 %v4096_v33  ;;  %v280_v22 = vld [vmem:[%s4509_s14] sm:$0xff] }
  0x2c   : > { %3879 = vrot.lane.b32.xlu1 %v3868_v23, %s4396_s29  ;;  %3208 = vmatprep.subr.msk.bf16.mxu0 %vm902_vm0, %v4097_v35 }
  0x2d   : > { %3511 = vmatpush3.bf16.msra.mxu1 %v4105_v16 }
  0x2e   : > { %3512 = vmatprep.subr.bf16.mxu1 %v4106_v17 }
  0x2f   : > { %3884 = vrot.lane.b32.xlu0 %v3883_v32, %s4395_s19  ;;  %926 = vmatpush1.bf16.msra.mxu0 %v904_v30 }
  0x30   : > { %3889 = vrot.lane.b32.xlu1 %v3888_v34, %s4397_s8 }
  0x33   : > { %3894 = vrot.lane.b32.xlu0 %v3883_v32, %s4394_s18 }
  0x34   : > { %3899 = vrot.lane.b32.xlu1 %v3888_v34, %s4396_s29 }
  0x37   : > { %3904 = vrot.lane.b32.xlu0 %v3903_v38, %s4395_s19 }
  0x38   : > { %3909 = vrot.lane.b32.xlu1 %v3908_v39, %s4397_s8 }
  0x3b   : > { %3914 = vrot.lane.b32.xlu0 %v3903_v38, %s4394_s18 }
  0x3c   : > { %3919 = vrot.lane.b32.xlu1 %v3908_v39, %s4396_s29 }
  0x3f   : > { %3924 = vrot.lane.b32.xlu0 %v3923_v42, %s4395_s19 }
  0x40   : > { %3929 = vrot.lane.b32.xlu1 %v3928_v43, %s4397_s8 }
  0x43   : > { %3934 = vrot.lane.b32.xlu0 %v3923_v42, %s4394_s18 }
  0x44   : > { %3939 = vrot.lane.b32.xlu1 %v3928_v43, %s4396_s29 }
  0x47   : > { %3944 = vrot.lane.b32.xlu0 %v3943_v46, %s4395_s19 }
  0x48   : > { %3949 = vrot.lane.b32.xlu1 %v3948_v47, %s4397_s8 }
  0x4b   : > { %3954 = vrot.lane.b32.xlu0 %v3943_v46, %s4394_s18 }
  0x4c   : > { %3959 = vrot.lane.b32.xlu1 %v3948_v47, %s4396_s29 }
  0x4f   : > { %3964 = vrot.lane.b32.xlu0 %v3963_v50, %s4395_s19 }
  0x50   : > { %3969 = vrot.lane.b32.xlu1 %v3968_v51, %s4397_s8 }
  0x53   : > { %3974 = vrot.lane.b32.xlu0 %v3963_v50, %s4394_s18 }
  0x54   : > { %3979 = vrot.lane.b32.xlu1 %v3968_v51, %s4396_s29 }
  0x57   : > { %3984 = vrot.lane.b32.xlu0 %v3983_v54, %s4395_s19 }
  0x58   : > { %3989 = vrot.lane.b32.xlu1 %v3988_v55, %s4397_s8 }
  0x5b   : > { %3994 = vrot.lane.b32.xlu0 %v3983_v54, %s4394_s18 }
  0x5c   : > { %3999 = vrot.lane.b32.xlu1 %v3988_v55, %s4396_s29 }
  0x5f   : > { %4004 = vrot.lane.b32.xlu0 %v4003_v58, %s4395_s19 }
  0x60   : > { %4009 = vrot.lane.b32.xlu1 %v4008_v59, %s4397_s8 }
  0x63   : > { %4014 = vrot.lane.b32.xlu0 %v4003_v58, %s4394_s18 }
  0x64   : > { %4019 = vrot.lane.b32.xlu1 %v4008_v59, %s4396_s29 }
  0x67   : > { %4024 = vrot.lane.b32.xlu0 %v4023_v62, %s4395_s19 }
  0x68   : > { %4029 = vrot.lane.b32.xlu1 %v4028_v63, %s4397_s8 }
  0x6b   : > { %4034 = vrot.lane.b32.xlu0 %v4023_v62, %s4394_s18 }
  0x6c   : > { %4039 = vrot.lane.b32.xlu1 %v4028_v63, %s4396_s29 }
  0x6f   : > { %4044 = vrot.lane.b32.xlu0 %v4043_v2, %s4395_s19 }
  0x70   : > { %4049 = vrot.lane.b32.xlu1 %v4048_v3, %s4397_s8 }
  0x73   : > { %4054 = vrot.lane.b32.xlu0 %v4043_v2, %s4394_s18 }
  0x74   : > { %4059 = vrot.lane.b32.xlu1 %v4048_v3, %s4396_s29 }
  0x77   : > { %4064 = vrot.lane.b32.xlu0 %v4063_v12, %s4395_s19  ;;  %s272_s19 = scalar_lea.vmem [#allocation2], %s3188_s15 }
  0x78   : > { %4069 = vrot.lane.b32.xlu1 %v4068_v14, %s4397_s8  ;;  %s3125_s29 = sshll.u32 %s272_s19, 4  ;;  %s5548_s29 = int_to_ptr.vmem [resolvable:$true] %s3125_s29 }
  0x79   : > { %p4337_p0 = scmp.lt.s32.totalorder %s5548_s29, %s4335_s23 }
  0x8d   : > { %v3835_v18 = vpop.permute.xlu0 %3834 }
  0x8e   : > { %v3845_v19 = vpop.permute.xlu1 %3844  ;;  %v3837_v20 = vunpack.i.h.bf16 %v3835_v18  ;;  %v3836_v21 = vunpack.i.l.bf16 %v3835_v18 }
  0x8f   : > { %v3847_v24 = vunpack.i.h.bf16 %v3845_v19  ;;  %v3846_v25 = vunpack.i.l.bf16 %v3845_v19  ;;  %v4324_v19 = vld [vmem:[%s4509_s14 + $0x28] sm:$0xff] }
  0x90   : > { %v625_v29 = vsel %vm623_vm1, %v4512_v5, %v3837_v20  ;;  %v624_v30 = vsel %vm623_vm1, %v280_v22, %v3836_v21  ;;  %v4325_v21 = vld [vmem:[%s4509_s14 + $0x20] sm:$0xff] }
  0x91   : > { %v3840_v23 = vpop.permute.xlu0 %3839 }
  0x92   : > { %v3842_v26 = vunpack.i.h.bf16 %v3840_v23  ;;  %v3841_v27 = vunpack.i.l.bf16 %v3840_v23  ;;  %v3850_v28 = vpop.permute.xlu1 %3849 }
  0x93   : > { %v3852_v31 = vunpack.i.h.bf16 %v3850_v28  ;;  %v3851_v32 = vunpack.i.l.bf16 %v3850_v28 }
  0x94   : > { %v649_v33 = vsel %vm648_vm2, %v624_v30, %v3841_v27  ;;  %v650_v34 = vsel %vm648_vm2, %v625_v29, %v3842_v26 }
  0x95   : > { %v3855_v35 = vpop.permute.xlu0 %3854  ;;  %v724_v38 = vpack.c.bf16 %v3852_v31, %v3851_v32  ;;  %v674_v39 = vsel %vm673_vm3, %v649_v33, %v3846_v25  ;;  %v675_v42 = vsel %vm673_vm3, %v650_v34, %v3847_v24 }
  0x96   : > { %v3857_v43 = vunpack.i.h.bf16 %v3855_v35  ;;  %v3856_v46 = vunpack.i.l.bf16 %v3855_v35  ;;  %v3860_v47 = vpop.permute.xlu1 %3859  ;;  %v699_v5 = vsel %vm698_vm4, %v674_v39, %v3851_v32  ;;  %v700_v50 = vsel %vm698_vm4, %v675_v42, %v3852_v31 }
  0x97   : > { %v3862_v51 = vunpack.i.h.bf16 %v3860_v47  ;;  %v3861_v54 = vunpack.i.l.bf16 %v3860_v47  ;;  %3209 = vmatprep.mubr.msk.bf16.mxu0 %vm865_vm5, %v724_v38  ;;  %v723_v55 = vpack.c.bf16 %v700_v50, %v699_v5  ;;  %v4326_v50 = vld [vmem:[%s4509_s14 + $0x38] sm:$0xff] }
  0x98   : > { %v627_v58 = vsel %vm623_vm1, %v4518_v7, %v3857_v43  ;;  %v626_v59 = vsel %vm623_vm1, %v4515_v6, %v3856_v46 }
  0x99   : > { %v651_v62 = vsel %vm648_vm2, %v626_v59, %v3861_v54  ;;  %v652_v63 = vsel %vm648_vm2, %v627_v58, %v3862_v51  ;;  %v3865_v0 = vpop.permute.xlu0 %3864  ;;  %942 = vmatmul.mubr.bf16.vlgmr.msra.gmra.mrb[0].mxu0 %v723_v55  ;;  %v4327_v54 = vld [vmem:[%s4509_s14 + $0x30] sm:$0xff] }
  0x9a   : > { %v3867_v1 = vunpack.i.h.bf16 %v3865_v0  ;;  %v3866_v2 = vunpack.i.l.bf16 %v3865_v0  ;;  %v3870_v3 = vpop.permute.xlu1 %3869 }
  0x9b   : > { %v3872_v4 = vunpack.i.h.bf16 %v3870_v3  ;;  %v3871_v8 = vunpack.i.l.bf16 %v3870_v3 }
  0x9c   : > { %v676_v9 = vsel %vm673_vm3, %v651_v62, %v3866_v2  ;;  %v677_v7 = vsel %vm673_vm3, %v652_v63, %v3867_v1 }
  0x9d   : > { %v726_v10 = vpack.c.bf16 %v3872_v4, %v3871_v8  ;;  %v3875_v11 = vpop.permute.xlu0 %3874  ;;  %v701_v6 = vsel %vm698_vm4, %v676_v9, %v3871_v8  ;;  %v702_v12 = vsel %vm698_vm4, %v677_v7, %v3872_v4 }
  0x9e   : > { %v3877_v13 = vunpack.i.h.bf16 %v3875_v11  ;;  %v3876_v14 = vunpack.i.l.bf16 %v3875_v11  ;;  %v3880_v15 = vpop.permute.xlu1 %3879  ;;  %v725_v16 = vpack.c.bf16 %v702_v12, %v701_v6 }
  0x9f   : > { %v3882_v17 = vunpack.i.h.bf16 %v3880_v15  ;;  %v3881_v18 = vunpack.i.l.bf16 %v3880_v15  ;;  %3210 = vmatprep.mubr.msk.bf16.mxu0 %vm865_vm5, %v726_v10 }
  0xa0   : > { %v629_v20 = vsel %vm623_vm1, %v4324_v19, %v3877_v13  ;;  %v628_v22 = vsel %vm623_vm1, %v4325_v21, %v3876_v14  ;;  %v4329_v19 = vld [vmem:[%s4509_s14 + $0x40] sm:$0xff] }
  0xa1   : > { %v653_v23 = vsel %vm648_vm2, %v628_v22, %v3881_v18  ;;  %v654_v24 = vsel %vm648_vm2, %v629_v20, %v3882_v17  ;;  %v3885_v25 = vpop.permute.xlu0 %3884  ;;  %952 = vmatmul.mubr.bf16.gmra.mrb[4].mxu0 %v725_v16  ;;  %v4328_v17 = vld [vmem:[%s4509_s14 + $0x48] sm:$0xff]  ;;  %s3503_s14 = sshll.u32 %s4463_s28, 7  ;;  %s4330_s28 = scalar_lea.vmem %s5548_s29, 128 }
  0xa2   : > { %v3887_v26 = vunpack.i.h.bf16 %v3885_v25  ;;  %v3886_v27 = vunpack.i.l.bf16 %v3885_v25  ;;  %v3890_v28 = vpop.permute.xlu1 %3889  ;;  %s5546_s20 = scalar_lea.hbm %s5595_s7, %s3503_s14  ;;  %p4331_p11 = scmp.ne.s32.totalorder %s5548_s29, %s4330_s28 }
  0xa3   : > { %v3892_v29 = vunpack.i.h.bf16 %v3890_v28  ;;  %v3891_v30 = vunpack.i.l.bf16 %v3890_v28  ;;  %p4338_p1 = scmp.lt.s32.totalorder %s4336_s9, %s4330_s28 }
  0xa4   : > { %v678_v31 = vsel %vm673_vm3, %v653_v23, %v3886_v27  ;;  %v679_v32 = vsel %vm673_vm3, %v654_v24, %v3887_v26  ;;  %p4332_p12 = pnand %p4331_p11, %p4480_p5 }
  0xa5   : > { %v728_v33 = vpack.c.bf16 %v3892_v29, %v3891_v30  ;;  %v3895_v34 = vpop.permute.xlu0 %3894  ;;  %v703_v35 = vsel %vm698_vm4, %v678_v31, %v3891_v30  ;;  %v704_v38 = vsel %vm698_vm4, %v679_v32, %v3892_v29  ;;  %p4339_p2 = por %p4338_p1, %p4337_p0 }
  0xa6   : > { %v3897_v39 = vunpack.i.h.bf16 %v3895_v34  ;;  %v3896_v42 = vunpack.i.l.bf16 %v3895_v34  ;;  %v3900_v43 = vpop.permute.xlu1 %3899  ;;  %v727_v46 = vpack.c.bf16 %v704_v38, %v703_v35  ;;  %p4333_p13 = pneg %p4332_p12 }
  0xa7   : > { %v3902_v47 = vunpack.i.h.bf16 %v3900_v43  ;;  %v3901_v5 = vunpack.i.l.bf16 %v3900_v43  ;;  %3211 = vmatprep.mubr.msk.bf16.mxu0 %vm865_vm5, %v728_v33 }
  0xa8   : > { %v631_v51 = vsel %vm623_vm1, %v4326_v50, %v3897_v39  ;;  %v630_v55 = vsel %vm623_vm1, %v4327_v54, %v3896_v42  ;;  %p4340_p3 = pnand %p4339_p2, %p4333_p13 }
  0xa9   : > { %v655_v58 = vsel %vm648_vm2, %v630_v55, %v3901_v5  ;;  %v656_v59 = vsel %vm648_vm2, %v631_v51, %v3902_v47  ;;  %v3905_v62 = vpop.permute.xlu0 %3904  ;;  %962 = vmatmul.mubr.bf16.gmra.mrb[8].mxu0 %v727_v46 }
  0xaa   : > { %v3907_v63 = vunpack.i.h.bf16 %v3905_v62  ;;  %v3906_v0 = vunpack.i.l.bf16 %v3905_v62  ;;  %v3910_v1 = vpop.permute.xlu1 %3909 }
  0xab   : > { %v3912_v2 = vunpack.i.h.bf16 %v3910_v1  ;;  %v3911_v3 = vunpack.i.l.bf16 %v3910_v1 }
  0xac   : > { %v680_v4 = vsel %vm673_vm3, %v655_v58, %v3906_v0  ;;  %v681_v8 = vsel %vm673_vm3, %v656_v59, %v3907_v63 }
  0xad   : > { %v730_v9 = vpack.c.bf16 %v3912_v2, %v3911_v3  ;;  %v3915_v7 = vpop.permute.xlu0 %3914  ;;  %v705_v10 = vsel %vm698_vm4, %v680_v4, %v3911_v3  ;;  %v706_v11 = vsel %vm698_vm4, %v681_v8, %v3912_v2 }
  0xae   : > { %v3917_v6 = vunpack.i.h.bf16 %v3915_v7  ;;  %v3916_v12 = vunpack.i.l.bf16 %v3915_v7  ;;  %v3920_v13 = vpop.permute.xlu1 %3919  ;;  %v729_v14 = vpack.c.bf16 %v706_v11, %v705_v10 }
  0xaf   : > { %v3922_v15 = vunpack.i.h.bf16 %v3920_v13  ;;  %v3921_v16 = vunpack.i.l.bf16 %v3920_v13  ;;  %3212 = vmatprep.mubr.msk.bf16.mxu0 %vm865_vm5, %v730_v9 }
  0xb0   : > { %v633_v18 = vsel %vm623_vm1, %v4328_v17, %v3917_v6  ;;  %v632_v20 = vsel %vm623_vm1, %v4329_v19, %v3916_v12 }
  0xb1   : > { %v657_v21 = vsel %vm648_vm2, %v632_v20, %v3921_v16  ;;  %v658_v22 = vsel %vm648_vm2, %v633_v18, %v3922_v15  ;;  %v3925_v23 = vpop.permute.xlu0 %3924  ;;  %972 = vmatmul.mubr.bf16.gmra.mrb[12].mxu0 %v729_v14 }
  0xb2   : > { %v3927_v24 = vunpack.i.h.bf16 %v3925_v23  ;;  %v3926_v25 = vunpack.i.l.bf16 %v3925_v23  ;;  %v3930_v26 = vpop.permute.xlu1 %3929 }
  0xb3   : > { %v3932_v27 = vunpack.i.h.bf16 %v3930_v26  ;;  %v3931_v28 = vunpack.i.l.bf16 %v3930_v26 }
  0xb4   : > { %v682_v29 = vsel %vm673_vm3, %v657_v21, %v3926_v25  ;;  %v683_v30 = vsel %vm673_vm3, %v658_v22, %v3927_v24 }
  0xb5   : > { %v732_v31 = vpack.c.bf16 %v3932_v27, %v3931_v28  ;;  %v3935_v32 = vpop.permute.xlu0 %3934  ;;  %v707_v33 = vsel %vm698_vm4, %v682_v29, %v3931_v28  ;;  %v708_v34 = vsel %vm698_vm4, %v683_v30, %v3932_v27 }
  0xb6   : > { %v3937_v35 = vunpack.i.h.bf16 %v3935_v32  ;;  %v3936_v38 = vunpack.i.l.bf16 %v3935_v32  ;;  %v3940_v39 = vpop.permute.xlu1 %3939  ;;  %v731_v42 = vpack.c.bf16 %v708_v34, %v707_v33 }
  0xb7   : > { %v3942_v43 = vunpack.i.h.bf16 %v3940_v39  ;;  %v3941_v46 = vunpack.i.l.bf16 %v3940_v39  ;;  %3213 = vmatprep.mubr.msk.bf16.mxu0 %vm865_vm5, %v732_v31 }
  0xb8   : > { %v635_v47 = vsel %vm623_vm1, %v4586_v37, %v3937_v35  ;;  %v634_v5 = vsel %vm623_vm1, %v4582_v36, %v3936_v38 }
  0xb9   : > { %v659_v50 = vsel %vm648_vm2, %v634_v5, %v3941_v46  ;;  %v660_v51 = vsel %vm648_vm2, %v635_v47, %v3942_v43  ;;  %v3945_v54 = vpop.permute.xlu0 %3944  ;;  %982 = vmatmul.mubr.bf16.gmra.mrb[16].mxu0 %v731_v42 }
  0xba   : > { %v3947_v55 = vunpack.i.h.bf16 %v3945_v54  ;;  %v3946_v58 = vunpack.i.l.bf16 %v3945_v54  ;;  %v3950_v59 = vpop.permute.xlu1 %3949 }
  0xbb   : > { %v3952_v62 = vunpack.i.h.bf16 %v3950_v59  ;;  %v3951_v63 = vunpack.i.l.bf16 %v3950_v59 }
  0xbc   : > { %v684_v0 = vsel %vm673_vm3, %v659_v50, %v3946_v58  ;;  %v685_v1 = vsel %vm673_vm3, %v660_v51, %v3947_v55 }
  0xbd   : > { %v734_v2 = vpack.c.bf16 %v3952_v62, %v3951_v63  ;;  %v3955_v37 = vpop.permute.xlu0 %3954  ;;  %v709_v3 = vsel %vm698_vm4, %v684_v0, %v3951_v63  ;;  %v710_v36 = vsel %vm698_vm4, %v685_v1, %v3952_v62 }
  0xbe   : > { %v3957_v4 = vunpack.i.h.bf16 %v3955_v37  ;;  %v3956_v8 = vunpack.i.l.bf16 %v3955_v37  ;;  %v3960_v9 = vpop.permute.xlu1 %3959  ;;  %v733_v7 = vpack.c.bf16 %v710_v36, %v709_v3 }
  0xbf   : > { %v3962_v10 = vunpack.i.h.bf16 %v3960_v9  ;;  %v3961_v11 = vunpack.i.l.bf16 %v3960_v9  ;;  %3214 = vmatprep.mubr.msk.bf16.mxu0 %vm865_vm5, %v734_v2 }
  0xc0   : > { %v637_v6 = vsel %vm623_vm1, %v4600_v41, %v3957_v4  ;;  %v636_v12 = vsel %vm623_vm1, %v4596_v40, %v3956_v8 }
  0xc1   : > { %v661_v13 = vsel %vm648_vm2, %v636_v12, %v3961_v11  ;;  %v662_v14 = vsel %vm648_vm2, %v637_v6, %v3962_v10  ;;  %v3965_v15 = vpop.permute.xlu0 %3964  ;;  %992 = vmatmul.mubr.bf16.gmra.mrb[20].mxu0 %v733_v7 }
  0xc2   : > { %v3967_v16 = vunpack.i.h.bf16 %v3965_v15  ;;  %v3966_v17 = vunpack.i.l.bf16 %v3965_v15  ;;  %v3970_v18 = vpop.permute.xlu1 %3969 }
  0xc3   : > { %v3972_v19 = vunpack.i.h.bf16 %v3970_v18  ;;  %v3971_v20 = vunpack.i.l.bf16 %v3970_v18 }
  0xc4   : > { %v686_v21 = vsel %vm673_vm3, %v661_v13, %v3966_v17  ;;  %v687_v22 = vsel %vm673_vm3, %v662_v14, %v3967_v16 }
  0xc5   : > { %v736_v23 = vpack.c.bf16 %v3972_v19, %v3971_v20  ;;  %v3975_v41 = vpop.permute.xlu0 %3974  ;;  %v711_v24 = vsel %vm698_vm4, %v686_v21, %v3971_v20  ;;  %v712_v40 = vsel %vm698_vm4, %v687_v22, %v3972_v19 }
  0xc6   : > { %v3977_v25 = vunpack.i.h.bf16 %v3975_v41  ;;  %v3976_v26 = vunpack.i.l.bf16 %v3975_v41  ;;  %v3980_v27 = vpop.permute.xlu1 %3979  ;;  %v735_v28 = vpack.c.bf16 %v712_v40, %v711_v24 }
  0xc7   : > { %v3982_v29 = vunpack.i.h.bf16 %v3980_v27  ;;  %v3981_v30 = vunpack.i.l.bf16 %v3980_v27  ;;  %3215 = vmatprep.mubr.msk.bf16.mxu0 %vm865_vm5, %v736_v23 }
  0xc8   : > { %v639_v31 = vsel %vm623_vm1, %v4614_v45, %v3977_v25  ;;  %v638_v32 = vsel %vm623_vm1, %v4610_v44, %v3976_v26 }
  0xc9   : > { %v663_v33 = vsel %vm648_vm2, %v638_v32, %v3981_v30  ;;  %v664_v34 = vsel %vm648_vm2, %v639_v31, %v3982_v29  ;;  %v3985_v35 = vpop.permute.xlu0 %3984  ;;  %1002 = vmatmul.mubr.bf16.gmra.mrb[24].mxu0 %v735_v28 }
  0xca   : > { %v3987_v38 = vunpack.i.h.bf16 %v3985_v35  ;;  %v3986_v39 = vunpack.i.l.bf16 %v3985_v35  ;;  %v3990_v42 = vpop.permute.xlu1 %3989 }
  0xcb   : > { %v3992_v43 = vunpack.i.h.bf16 %v3990_v42  ;;  %v3991_v46 = vunpack.i.l.bf16 %v3990_v42 }
  0xcc   : > { %v688_v47 = vsel %vm673_vm3, %v663_v33, %v3986_v39  ;;  %v689_v5 = vsel %vm673_vm3, %v664_v34, %v3987_v38 }
  0xcd   : > { %v738_v50 = vpack.c.bf16 %v3992_v43, %v3991_v46  ;;  %v3995_v45 = vpop.permute.xlu0 %3994  ;;  %v713_v51 = vsel %vm698_vm4, %v688_v47, %v3991_v46  ;;  %v714_v44 = vsel %vm698_vm4, %v689_v5, %v3992_v43 }
  0xce   : > { %v3997_v54 = vunpack.i.h.bf16 %v3995_v45  ;;  %v3996_v55 = vunpack.i.l.bf16 %v3995_v45  ;;  %v4000_v58 = vpop.permute.xlu1 %3999  ;;  %v737_v59 = vpack.c.bf16 %v714_v44, %v713_v51 }
  0xcf   : > { %v4002_v62 = vunpack.i.h.bf16 %v4000_v58  ;;  %v4001_v63 = vunpack.i.l.bf16 %v4000_v58  ;;  %3216 = vmatprep.mubr.msk.bf16.mxu0 %vm865_vm5, %v738_v50 }
  0xd0   : > { %v641_v0 = vsel %vm623_vm1, %v4628_v49, %v3997_v54  ;;  %v640_v1 = vsel %vm623_vm1, %v4624_v48, %v3996_v55 }
  0xd1   : > { %v665_v2 = vsel %vm648_vm2, %v640_v1, %v4001_v63  ;;  %v666_v37 = vsel %vm648_vm2, %v641_v0, %v4002_v62  ;;  %v4005_v3 = vpop.permute.xlu0 %4004  ;;  %1012 = vmatmul.mubr.bf16.gmra.mrb[28].mxu0 %v737_v59 }
  0xd2   : > { %v4007_v36 = vunpack.i.h.bf16 %v4005_v3  ;;  %v4006_v4 = vunpack.i.l.bf16 %v4005_v3  ;;  %v4010_v8 = vpop.permute.xlu1 %4009 }
  0xd3   : > { %v4012_v9 = vunpack.i.h.bf16 %v4010_v8  ;;  %v4011_v7 = vunpack.i.l.bf16 %v4010_v8 }
  0xd4   : > { %v690_v10 = vsel %vm673_vm3, %v665_v2, %v4006_v4  ;;  %v691_v11 = vsel %vm673_vm3, %v666_v37, %v4007_v36 }
  0xd5   : > { %v740_v6 = vpack.c.bf16 %v4012_v9, %v4011_v7  ;;  %v4015_v49 = vpop.permute.xlu0 %4014  ;;  %v715_v12 = vsel %vm698_vm4, %v690_v10, %v4011_v7  ;;  %v716_v48 = vsel %vm698_vm4, %v691_v11, %v4012_v9 }
  0xd6   : > { %v4017_v13 = vunpack.i.h.bf16 %v4015_v49  ;;  %v4016_v14 = vunpack.i.l.bf16 %v4015_v49  ;;  %v4020_v15 = vpop.permute.xlu1 %4019  ;;  %v739_v16 = vpack.c.bf16 %v716_v48, %v715_v12 }
  0xd7   : > { %v4022_v17 = vunpack.i.h.bf16 %v4020_v15  ;;  %v4021_v18 = vunpack.i.l.bf16 %v4020_v15  ;;  %3217 = vmatprep.mubr.msk.bf16.mxu0 %vm865_vm5, %v740_v6  ;;  %v4107_v6 = vld [vmem:[%s5593_s5 + $0x18] sm:$0xff]   ;;  %v4108_v15 = vld [vmem:[%s5593_s5 + $0x60] sm:$0xff]  }
  0xd8   : > { %v643_v19 = vsel %vm623_vm1, %v4642_v53, %v4017_v13  ;;  %v642_v20 = vsel %vm623_vm1, %v4638_v52, %v4016_v14  ;;  %3513 = vmatpush3.bf16.msra.mxu1 %v4107_v6  ;;  %v4122_v6 = vld [vmem:[%s5593_s5 + $0xd8] sm:$0xff]  }
  0xd9   : > { %v667_v21 = vsel %vm648_vm2, %v642_v20, %v4021_v18  ;;  %v668_v22 = vsel %vm648_vm2, %v643_v19, %v4022_v17  ;;  %v4025_v23 = vpop.permute.xlu0 %4024  ;;  %1022 = vmatmul.mubr.bf16.gmra.mrb[32].mxu0 %v739_v16  ;;  %v4109_v17 = vld [vmem:[%s5593_s5 + $0x20] sm:$0xff]   ;;  %3514 = vmatprep.subr.bf16.mxu1 %v4108_v15  ;;  %v4110_v18 = vld [vmem:[%s5593_s5 + $0x68] sm:$0xff]   ;;  %v4112_v20 = vld [vmem:[%s5593_s5 + $0x70] sm:$0xff]  }
  0xda   : > { %v4027_v41 = vunpack.i.h.bf16 %v4025_v23  ;;  %v4026_v24 = vunpack.i.l.bf16 %v4025_v23  ;;  %v4030_v40 = vpop.permute.xlu1 %4029  ;;  %v4111_v19 = vld [vmem:[%s5593_s5 + $0x28] sm:$0xff]   ;;  %v4115_v23 = vld [vmem:[%s5593_s5 + $0x38] sm:$0xff]  }
  0xdb   : > { %v4032_v25 = vunpack.i.h.bf16 %v4030_v40  ;;  %v4031_v26 = vunpack.i.l.bf16 %v4030_v40 }
  0xdc   : > { %v692_v27 = vsel %vm673_vm3, %v667_v21, %v4026_v24  ;;  %v693_v28 = vsel %vm673_vm3, %v668_v22, %v4027_v41  ;;  %3515 = vmatpush3.bf16.msra.mxu1 %v4109_v17  ;;  %v4113_v21 = vld [vmem:[%s5593_s5 + $0x30] sm:$0xff]   ;;  %v4114_v22 = vld [vmem:[%s5593_s5 + $0x78] sm:$0xff]   ;;  %v4116_v41 = vld [vmem:[%s5593_s5 + $0xc0] sm:$0xff]   ;;  %v767_v24 = vlaneseq }
  0xdd   : > { %v742_v29 = vpack.c.bf16 %v4032_v25, %v4031_v26  ;;  %v4035_v53 = vpop.permute.xlu0 %4034  ;;  %v717_v30 = vsel %vm698_vm4, %v692_v27, %v4031_v26  ;;  %v718_v52 = vsel %vm698_vm4, %v693_v28, %v4032_v25  ;;  %3516 = vmatprep.subr.bf16.mxu1 %v4110_v18  ;;  %v765_v26 = vld [vmem:[%s5594_s6] ss:$8 sm:$0x3] }
  0xde   : > { %v4037_v31 = vunpack.i.h.bf16 %v4035_v53  ;;  %v4036_v32 = vunpack.i.l.bf16 %v4035_v53  ;;  %v4040_v33 = vpop.permute.xlu1 %4039  ;;  %v741_v34 = vpack.c.bf16 %v718_v52, %v717_v30  ;;  %v4877_v40 = vshrl.u32 %v767_v24, 7 }
  0xdf   : > { %v4042_v35 = vunpack.i.h.bf16 %v4040_v33  ;;  %v4041_v38 = vunpack.i.l.bf16 %v4040_v33  ;;  %3218 = vmatprep.mubr.msk.bf16.mxu0 %vm865_vm5, %v742_v29 }
  0xe0   : > { %v645_v39 = vsel %vm623_vm1, %v4656_v57, %v4037_v31  ;;  %v644_v42 = vsel %vm623_vm1, %v4652_v56, %v4036_v32  ;;  %3517 = vmatpush3.bf16.msra.mxu1 %v4111_v19  ;;  %v769_v25 = vsub.s32 0, %v4877_v40  ;;  %v773_v27 = vsub.s32 1, %v4877_v40 }
  0xe1   : > { %v669_v43 = vsel %vm648_vm2, %v644_v42, %v4041_v38  ;;  %v670_v46 = vsel %vm648_vm2, %v645_v39, %v4042_v35  ;;  %v4045_v47 = vpop.permute.xlu0 %4044  ;;  %1032 = vmatmul.mubr.bf16.gmra.mrb[36].mxu0 %v741_v34  ;;  %3518 = vmatprep.subr.bf16.mxu1 %v4112_v20 }
  0xe2   : > { %v4047_v5 = vunpack.i.h.bf16 %v4045_v47  ;;  %v4046_v50 = vunpack.i.l.bf16 %v4045_v47  ;;  %v4050_v45 = vpop.permute.xlu1 %4049  ;;  %v4886_v28 = vrot.slane %v765_v26, %v769_v25  ;;  %v4890_v53 = vrot.slane %v765_v26, %v773_v27 }
  0xe3   : > { %v4052_v51 = vunpack.i.h.bf16 %v4050_v45  ;;  %v4051_v44 = vunpack.i.l.bf16 %v4050_v45 }
  0xe4   : > { %v694_v54 = vsel %vm673_vm3, %v669_v43, %v4046_v50  ;;  %v695_v55 = vsel %vm673_vm3, %v670_v46, %v4047_v5  ;;  %3519 = vmatpush3.bf16.msra.mxu1 %v4113_v21  ;;  %v4125_v21 = vld [vmem:[%s5593_s5 + $0xa0] sm:$0xff]  }
  0xe5   : > { %v744_v58 = vpack.c.bf16 %v4052_v51, %v4051_v44  ;;  %v4055_v57 = vpop.permute.xlu0 %4054  ;;  %v719_v59 = vsel %vm698_vm4, %v694_v54, %v4051_v44  ;;  %v720_v56 = vsel %vm698_vm4, %v695_v55, %v4052_v51  ;;  %3520 = vmatprep.subr.bf16.mxu1 %v4114_v22 }
  0xe6   : > { %v4057_v62 = vunpack.i.h.bf16 %v4055_v57  ;;  %v4056_v63 = vunpack.i.l.bf16 %v4055_v57  ;;  %v4060_v0 = vpop.permute.xlu1 %4059  ;;  %v743_v1 = vpack.c.bf16 %v720_v56, %v719_v59  ;;  %v4117_v59 = vld [vmem:[%s5593_s5 + $0x80] sm:$0xff]  }
  0xe7   : > { %v4062_v2 = vunpack.i.h.bf16 %v4060_v0  ;;  %v4061_v37 = vunpack.i.l.bf16 %v4060_v0  ;;  %3219 = vmatprep.mubr.msk.bf16.mxu0 %vm865_vm5, %v744_v58 }
  0xe8   : > { %v647_v3 = vsel %vm623_vm1, %v4670_v61, %v4057_v62  ;;  %v646_v36 = vsel %vm623_vm1, %v4666_v60, %v4056_v63  ;;  %3521 = vmatpush3.bf16.msra.mxu1 %v4115_v23  ;;  %v4118_v62 = vld [vmem:[%s5593_s5 + $0xc8] sm:$0xff]  }
  0xe9   : > { %v671_v4 = vsel %vm648_vm2, %v646_v36, %v4061_v37  ;;  %v672_v8 = vsel %vm648_vm2, %v647_v3, %v4062_v2  ;;  %v4065_v9 = vpop.permute.xlu0 %4064  ;;  %1042 = vmatmul.mubr.bf16.gmra.mrb[40].mxu0 %v743_v1  ;;  %3558 = vmatprep.subr.bf16.mxu1 %v4116_v41  ;;  %v4119_v36 = vld [vmem:[%s5593_s5 + $0x88] sm:$0xff]  }
  0xea   : > { %v4067_v7 = vunpack.i.h.bf16 %v4065_v9  ;;  %v4066_v10 = vunpack.i.l.bf16 %v4065_v9  ;;  %v4070_v11 = vpop.permute.xlu1 %4069  ;;  %v4126_v23 = vld [vmem:[%s5593_s5 + $0xe8] sm:$0xff]  }
  0xeb   : > { %v4072_v49 = vunpack.i.h.bf16 %v4070_v11  ;;  %v4071_v12 = vunpack.i.l.bf16 %v4070_v11 }
  0xec   : > { %v696_v61 = vsel %vm673_vm3, %v671_v4, %v4066_v10  ;;  %v697_v48 = vsel %vm673_vm3, %v672_v8, %v4067_v7  ;;  %v4120_v8 = vld [vmem:[%s5593_s5 + $0xd0] sm:$0xff]  }
  0xed   : > { %v746_v60 = vpack.c.bf16 %v4072_v49, %v4071_v12  ;;  %v721_v13 = vsel %vm698_vm4, %v696_v61, %v4071_v12  ;;  %v722_v14 = vsel %vm698_vm4, %v697_v48, %v4072_v49  ;;  %v4121_v10 = vld [vmem:[%s5593_s5 + $0x90] sm:$0xff]  }
  0xee   : > { %v745_v16 = vpack.c.bf16 %v722_v14, %v721_v13  ;;  %v4123_v14 = vld [vmem:[%s5593_s5 + $0x98] sm:$0xff]  }
  0xef   : > { %3220 = vmatprep.mubr.msk.bf16.mxu0 %vm865_vm5, %v746_v60 }
  0xf1   : > { %1052 = vmatmul.mubr.bf16.gmra.mrb[44].mxu0 %v745_v16  ;;  %v4124_v16 = vld [vmem:[%s5593_s5 + $0xe0] sm:$0xff]  }
 0x16c   : > { %v943_v29 = vpop.f32.mrb[0].mxu0 }
 0x16d   : > { %v945_v30 = vpop.f32.mrb[1].mxu0  ;;  %v944_v31 = vadd.f32 %v943_v29, %v4886_v28 }
 0x16e   : > { %v947_v52 = vpop.f32.mrb[2].mxu0  ;;  %v946_v34 = vadd.f32 %v945_v30, %v4890_v53 }
 0x16f   : > { %v948_v32 = vadd.f32 %v947_v52, %v4886_v28  ;;  %v949_v33 = vpop.f32.mrb[3].mxu0 }
 0x170   : > { %v950_v35 = vadd.f32 %v949_v33, %v4890_v53  ;;  %v4128_v33 = vld [vmem:[%s5593_s5 + $0xf0] sm:$0xff]  }
 0x171   : > { %v1062_v38 = vmax.f32 %v944_v31, %v948_v32  ;;  %v4127_v31 = vld [vmem:[%s5593_s5 + $0xa8] sm:$0xff]  }
 0x172   : > { %v1063_v39 = vmax.f32 %v946_v34, %v950_v35 }
 0x174   : > { %v953_v42 = vpop.f32.mrb[4].mxu0 }
 0x175   : > { %v955_v43 = vpop.f32.mrb[5].mxu0  ;;  %v954_v47 = vadd.f32 %v953_v42, %v4886_v28  ;;  %v4130_v42 = vld [vmem:[%s5593_s5 + $0xf8] sm:$0xff]  }
 0x176   : > { %v957_v46 = vpop.f32.mrb[6].mxu0  ;;  %v956_v45 = vadd.f32 %v955_v43, %v4890_v53 }
 0x177   : > { %v958_v5 = vadd.f32 %v957_v46, %v4886_v28  ;;  %v959_v50 = vpop.f32.mrb[7].mxu0 }
 0x178   : > { %v960_v51 = vadd.f32 %v959_v50, %v4890_v53 }
 0x179   : > { %v1064_v44 = vmax.f32 %v954_v47, %v958_v5 }
 0x17a   : > { %v1065_v54 = vmax.f32 %v956_v45, %v960_v51  ;;  %v4131_v51 = vld [vmem:[%s5593_s5 + $0xb8] sm:$0xff]  }
 0x17b   : > { %v4900_v55 = vpack.c.bf16 %v1064_v44, %v1062_v38  ;;  %v4129_v38 = vld [vmem:[%s5593_s5 + $0xb0] sm:$0xff]  }
 0x17c   : > { %v963_v58 = vpop.f32.mrb[8].mxu0  ;;  %v4902_v57 = vpack.c.bf16 %v1065_v54, %v1063_v39 }
 0x17d   : > { %v965_v56 = vpop.f32.mrb[9].mxu0  ;;  %v964_v0 = vadd.f32 %v963_v58, %v4886_v28 }
 0x17e   : > { %v967_v63 = vpop.f32.mrb[10].mxu0  ;;  %1291 = vmatprep.mubr.bf16.mxu1 %v4902_v57  ;;  %v966_v37 = vadd.f32 %v965_v56, %v4890_v53 }
 0x17f   : > { %v968_v1 = vadd.f32 %v967_v63, %v4886_v28  ;;  %v969_v2 = vpop.f32.mrb[11].mxu0  ;;  %1292 = vmatmul.mubr.bf16.vlgmr.msra.gmra.mrb[0].mxu1 %v4900_v55 }
 0x180   : > { %v970_v3 = vadd.f32 %v969_v2, %v4890_v53  ;;  %3559 = vmatpush3.bf16.msra.mxu1 %v4117_v59 }
 0x181   : > { %v1066_v4 = vmax.f32 %v964_v0, %v968_v1  ;;  %3560 = vmatprep.subr.bf16.mxu1 %v4118_v62 }
 0x182   : > { %v1067_v9 = vmax.f32 %v966_v37, %v970_v3 }
 0x184   : > { %v973_v7 = vpop.f32.mrb[12].mxu0  ;;  %3561 = vmatpush3.bf16.msra.mxu1 %v4119_v36 }
 0x185   : > { %v975_v11 = vpop.f32.mrb[13].mxu0  ;;  %3562 = vmatprep.subr.bf16.mxu1 %v4120_v8  ;;  %v974_v12 = vadd.f32 %v973_v7, %v4886_v28 }
 0x186   : > { %v977_v49 = vpop.f32.mrb[14].mxu0  ;;  %v976_v60 = vadd.f32 %v975_v11, %v4890_v53 }
 0x187   : > { %v978_v61 = vadd.f32 %v977_v49, %v4886_v28  ;;  %v979_v48 = vpop.f32.mrb[15].mxu0 }
 0x188   : > { %v980_v13 = vadd.f32 %v979_v48, %v4890_v53  ;;  %3563 = vmatpush3.bf16.msra.mxu1 %v4121_v10 }
 0x189   : > { %v1068_v15 = vmax.f32 %v974_v12, %v978_v61  ;;  %3564 = vmatprep.subr.bf16.mxu1 %v4122_v6 }
 0x18a   : > { %v1069_v17 = vmax.f32 %v976_v60, %v980_v13 }
 0x18b   : > { %v4938_v18 = vpack.c.bf16 %v1068_v15, %v1066_v4 }
 0x18c   : > { %v983_v19 = vpop.f32.mrb[16].mxu0  ;;  %v4940_v20 = vpack.c.bf16 %v1069_v17, %v1067_v9  ;;  %3565 = vmatpush3.bf16.msra.mxu1 %v4123_v14 }
 0x18d   : > { %v985_v22 = vpop.f32.mrb[17].mxu0  ;;  %3566 = vmatprep.subr.bf16.mxu1 %v4124_v16  ;;  %v984_v24 = vadd.f32 %v983_v19, %v4886_v28 }
 0x18e   : > { %v987_v41 = vpop.f32.mrb[18].mxu0  ;;  %1299 = vmatprep.mubr.bf16.mxu1 %v4940_v20  ;;  %v986_v30 = vadd.f32 %v985_v22, %v4890_v53 }
 0x18f   : > { %v988_v26 = vadd.f32 %v987_v41, %v4886_v28  ;;  %v989_v29 = vpop.f32.mrb[19].mxu0  ;;  %1300 = vmatmul.mubr.bf16.gmra.mrb[4].mxu1 %v4938_v18 }
 0x190   : > { %v990_v52 = vadd.f32 %v989_v29, %v4890_v53  ;;  %3567 = vmatpush3.bf16.msra.mxu1 %v4125_v21 }
 0x191   : > { %v1070_v32 = vmax.f32 %v984_v24, %v988_v26  ;;  %3568 = vmatprep.subr.bf16.mxu1 %v4126_v23 }
 0x192   : > { %v1071_v34 = vmax.f32 %v986_v30, %v990_v52 }
 0x194   : > { %v993_v35 = vpop.f32.mrb[20].mxu0  ;;  %3569 = vmatpush3.bf16.msra.mxu1 %v4127_v31 }
 0x195   : > { %v995_v39 = vpop.f32.mrb[21].mxu0  ;;  %3570 = vmatprep.subr.bf16.mxu1 %v4128_v33  ;;  %v994_v46 = vadd.f32 %v993_v35, %v4886_v28 }
 0x196   : > { %v997_v43 = vpop.f32.mrb[22].mxu0  ;;  %v996_v50 = vadd.f32 %v995_v39, %v4890_v53 }
 0x197   : > { %v998_v47 = vadd.f32 %v997_v43, %v4886_v28  ;;  %v999_v5 = vpop.f32.mrb[23].mxu0 }
 0x198   : > { %v1000_v45 = vadd.f32 %v999_v5, %v4890_v53  ;;  %3571 = vmatpush3.bf16.msra.mxu1 %v4129_v38 }
 0x199   : > { %v1072_v44 = vmax.f32 %v994_v46, %v998_v47  ;;  %3572 = vmatprep.subr.bf16.mxu1 %v4130_v42 }
 0x19a   : > { %v1073_v54 = vmax.f32 %v996_v50, %v1000_v45 }
 0x19b   : > { %v4973_v58 = vpack.c.bf16 %v1072_v44, %v1070_v32 }
 0x19c   : > { %v1003_v59 = vpop.f32.mrb[24].mxu0  ;;  %v4975_v56 = vpack.c.bf16 %v1073_v54, %v1071_v34  ;;  %3573 = vmatpush3.bf16.msra.mxu1 %v4131_v51 }
 0x19d   : > { %v1005_v62 = vpop.f32.mrb[25].mxu0  ;;  %v1004_v0 = vadd.f32 %v1003_v59, %v4886_v28 }
 0x19e   : > { %v1007_v63 = vpop.f32.mrb[26].mxu0  ;;  %1307 = vmatprep.mubr.bf16.mxu1 %v4975_v56  ;;  %v1006_v37 = vadd.f32 %v1005_v62, %v4890_v53 }
 0x19f   : > { %v1008_v1 = vadd.f32 %v1007_v63, %v4886_v28  ;;  %v1009_v2 = vpop.f32.mrb[27].mxu0  ;;  %1308 = vmatmul.mubr.bf16.gmra.mrb[8].mxu1 %v4973_v58 }
 0x1a0   : > { %v1010_v3 = vadd.f32 %v1009_v2, %v4890_v53 }
 0x1a1   : > { %v1074_v36 = vmax.f32 %v1004_v0, %v1008_v1 }
 0x1a2   : > { %v1075_v4 = vmax.f32 %v1006_v37, %v1010_v3 }
 0x1a4   : > { %v1013_v8 = vpop.f32.mrb[28].mxu0 }
 0x1a5   : > { %v1015_v9 = vpop.f32.mrb[29].mxu0  ;;  %v1014_v10 = vadd.f32 %v1013_v8, %v4886_v28 }
 0x1a6   : > { %v1017_v7 = vpop.f32.mrb[30].mxu0  ;;  %v1016_v49 = vadd.f32 %v1015_v9, %v4890_v53 }
 0x1a7   : > { %v1018_v11 = vadd.f32 %v1017_v7, %v4886_v28  ;;  %v1019_v6 = vpop.f32.mrb[31].mxu0 }
 0x1a8   : > { %v1020_v12 = vadd.f32 %v1019_v6, %v4890_v53  ;;  %v4149_v6 = vld [vmem:[%s5590_s2 + $0x54] ss:$8 sps:$4 sm:$0xff]  }
 0x1a9   : > { %v1076_v61 = vmax.f32 %v1014_v10, %v1018_v11  ;;  %v4146_v10 = vld [vmem:[%s5590_s2 + $0x44] ss:$8 sps:$4 sm:$0xff]   ;;  %v4144_v11 = vld [vmem:[%s5590_s2 + $0x40] ss:$8 sps:$4 sm:$0xff]  }
 0x1aa   : > { %v1077_v48 = vmax.f32 %v1016_v49, %v1020_v12  ;;  %v4147_v49 = vld [vmem:[%s5590_s2 + $0x50] ss:$8 sps:$4 sm:$0xff]   ;;  %v4150_v12 = vld [vmem:[%s5590_s2 + $0x60] ss:$8 sps:$4 sm:$0xff]  }
 0x1ab   : > { %v4987_v60 = vpack.c.bf16 %v1076_v61, %v1074_v36  ;;  %v4152_v61 = vld [vmem:[%s5590_s2 + $0x64] ss:$8 sps:$4 sm:$0xff]  }
 0x1ac   : > { %v1023_v13 = vpop.f32.mrb[32].mxu0  ;;  %v1158_v14 = vpack.c.bf16 %v1077_v48, %v1075_v4  ;;  %v4155_v48 = vld [vmem:[%s5590_s2 + $0x74] ss:$8 sps:$4 sm:$0xff]  }
 0x1ad   : > { %v1025_v15 = vpop.f32.mrb[33].mxu0  ;;  %v1024_v17 = vadd.f32 %v1023_v13, %v4886_v28  ;;  %v4156_v13 = vld [vmem:[%s5590_s2 + $0x80] ss:$8 sps:$4 sm:$0xff]  }
 0x1ae   : > { %v1027_v16 = vpop.f32.mrb[34].mxu0  ;;  %1315 = vmatprep.mubr.bf16.mxu1 %v1158_v14  ;;  %v1026_v22 = vadd.f32 %v1025_v15, %v4890_v53  ;;  %v4159_v15 = vld [vmem:[%s5590_s2 + $0x90] ss:$8 sps:$4 sm:$0xff]  }
 0x1af   : > { %v1028_v19 = vadd.f32 %v1027_v16, %v4886_v28  ;;  %v1029_v21 = vpop.f32.mrb[35].mxu0  ;;  %1316 = vmatmul.mubr.bf16.gmra.mrb[12].mxu1 %v4987_v60  ;;  %v4161_v16 = vld [vmem:[%s5590_s2 + $0x94] ss:$8 sps:$4 sm:$0xff]  }
 0x1b0   : > { %v1030_v23 = vadd.f32 %v1029_v21, %v4890_v53  ;;  %v4165_v21 = vld [vmem:[%s5590_s2 + $0xb0] ss:$8 sps:$4 sm:$0xff]  }
 0x1b1   : > { %v1078_v41 = vmax.f32 %v1024_v17, %v1028_v19  ;;  %v4164_v17 = vld [vmem:[%s5590_s2 + $0xa4] ss:$8 sps:$4 sm:$0xff]   ;;  %v4162_v19 = vld [vmem:[%s5590_s2 + $0xa0] ss:$8 sps:$4 sm:$0xff]  }
 0x1b2   : > { %v1079_v24 = vmax.f32 %v1026_v22, %v1030_v23  ;;  %v4167_v22 = vld [vmem:[%s5590_s2 + $0xb4] ss:$8 sps:$4 sm:$0xff]   ;;  %v4168_v23 = vld [vmem:[%s5590_s2 + $0xc0] ss:$8 sps:$4 sm:$0xff]  }
 0x1b4   : > { %v1033_v26 = vpop.f32.mrb[36].mxu0 }
 0x1b5   : > { %v1035_v29 = vpop.f32.mrb[37].mxu0  ;;  %v1034_v52 = vadd.f32 %v1033_v26, %v4886_v28  ;;  %v4171_v26 = vld [vmem:[%s5590_s2 + $0xd0] ss:$8 sps:$4 sm:$0xff]  }
 0x1b6   : > { %v1037_v30 = vpop.f32.mrb[38].mxu0  ;;  %v1036_v33 = vadd.f32 %v1035_v29, %v4890_v53  ;;  %v4176_v29 = vld [vmem:[%s5590_s2 + $0xe4] ss:$8 sps:$4 sm:$0xff]  }
 0x1b7   : > { %v1038_v31 = vadd.f32 %v1037_v30, %v4886_v28  ;;  %v1039_v32 = vpop.f32.mrb[39].mxu0  ;;  %v4174_v30 = vld [vmem:[%s5590_s2 + $0xe0] ss:$8 sps:$4 sm:$0xff]  }
 0x1b8   : > { %v1040_v34 = vadd.f32 %v1039_v32, %v4890_v53  ;;  %v4182_v32 = vld [vmem:[%s5590_s2 + $0x104] ss:$8 sps:$4 sm:$0xff]  }
 0x1b9   : > { %v1080_v35 = vmax.f32 %v1034_v52, %v1038_v31  ;;  %v4179_v52 = vld [vmem:[%s5590_s2 + $0xf4] ss:$8 sps:$4 sm:$0xff]   ;;  %v4177_v31 = vld [vmem:[%s5590_s2 + $0xf0] ss:$8 sps:$4 sm:$0xff]  }
 0x1ba   : > { %v1081_v38 = vmax.f32 %v1036_v33, %v1040_v34 }
 0x1bb   : > { %v1159_v39 = vpack.c.bf16 %v1080_v35, %v1078_v41  ;;  %v4170_v41 = vld [vmem:[%s5590_s2 + $0xc4] ss:$8 sps:$4 sm:$0xff]  }
 0x1bc   : > { %v1043_v42 = vpop.f32.mrb[40].mxu0  ;;  %v1160_v43 = vpack.c.bf16 %v1081_v38, %v1079_v24  ;;  %v4173_v24 = vld [vmem:[%s5590_s2 + $0xd4] ss:$8 sps:$4 sm:$0xff]  }
 0x1bd   : > { %v1045_v46 = vpop.f32.mrb[41].mxu0  ;;  %v1044_v5 = vadd.f32 %v1043_v42, %v4886_v28 }
 0x1be   : > { %v1047_v47 = vpop.f32.mrb[42].mxu0  ;;  %1323 = vmatprep.mubr.bf16.mxu1 %v1160_v43  ;;  %v1046_v51 = vadd.f32 %v1045_v46, %v4890_v53 }
 0x1bf   : > { %v1048_v50 = vadd.f32 %v1047_v47, %v4886_v28  ;;  %v1049_v45 = vpop.f32.mrb[43].mxu0  ;;  %1324 = vmatmul.mubr.bf16.gmra.mrb[16].mxu1 %v1159_v39 }
 0x1c0   : > { %v1050_v44 = vadd.f32 %v1049_v45, %v4890_v53 }
 0x1c1   : > { %v1082_v54 = vmax.f32 %v1044_v5, %v1048_v50 }
 0x1c2   : > { %v1083_v59 = vmax.f32 %v1046_v51, %v1050_v44 }
 0x1c4   : > { %v1053_v62 = vpop.f32.mrb[44].mxu0 }
 0x1c5   : > { %v1055_v63 = vpop.f32.mrb[45].mxu0  ;;  %v1054_v1 = vadd.f32 %v1053_v62, %v4886_v28 }
 0x1c6   : > { %v1057_v0 = vpop.f32.mrb[46].mxu0  ;;  %v1056_v3 = vadd.f32 %v1055_v63, %v4890_v53 }
 0x1c7   : > { %v1058_v2 = vadd.f32 %v1057_v0, %v4886_v28  ;;  %v1059_v37 = vpop.f32.mrb[47].mxu0  ;;  %v4132_v28 = vld [vmem:[%s5590_s2] ss:$8 sps:$4 sm:$0xff]  }
 0x1c8   : > { %v1060_v36 = vadd.f32 %v1059_v37, %v4890_v53  ;;  %v4134_v53 = vld [vmem:[%s5590_s2 + $0x4] ss:$8 sps:$4 sm:$0xff]  }
 0x1c9   : > { %v1084_v4 = vmax.f32 %v1054_v1, %v1058_v2  ;;  %2063 = vmatprep.subr.bf16.mxu0 %v4134_v53 }
 0x1ca   : > { %v1085_v8 = vmax.f32 %v1056_v3, %v1060_v36  ;;  %2064 = vmatpush1.bf16.msra.mxu0 %v4132_v28 }
 0x1cb   : > { %v1161_v9 = vpack.c.bf16 %v1084_v4, %v1082_v54 }
 0x1cc   : > { %v1162_v7 = vpack.c.bf16 %v1085_v8, %v1083_v59 }
 0x1ce   : > { %1331 = vmatprep.mubr.bf16.mxu1 %v1162_v7 }
 0x1cf   : > { %1332 = vmatmul.mubr.bf16.gmra.mrb[20].mxu1 %v1161_v9 }
 0x1d0   : > { %1468 = vmatprep.mubr.bf16.mxu1 %v4902_v57  ;;  %v4137_v57 = vld [vmem:[%s5590_s2 + $0x14] ss:$8 sps:$4 sm:$0xff]  }
 0x1d1   : > { %2065 = vmatprep.subr.bf16.mxu0 %v4137_v57 }
 0x1d7   : > { %1469 = vmatmul.mubr.bf16.vlgmr.msra.gmra.mrb[24].mxu1 %v4900_v55  ;;  %v4135_v55 = vld [vmem:[%s5590_s2 + $0x10] ss:$8 sps:$4 sm:$0xff]  }
 0x1d8   : > { %1476 = vmatprep.mubr.bf16.mxu1 %v4940_v20  ;;  %2066 = vmatpush1.bf16.msra.mxu0 %v4135_v55  ;;  %v4138_v20 = vld [vmem:[%s5590_s2 + $0x20] ss:$8 sps:$4 sm:$0xff]  }
 0x1df   : > { %1477 = vmatmul.mubr.bf16.gmra.mrb[28].mxu1 %v4938_v18  ;;  %v4140_v18 = vld [vmem:[%s5590_s2 + $0x24] ss:$8 sps:$4 sm:$0xff]  }
 0x1e0   : > { %1484 = vmatprep.mubr.bf16.mxu1 %v4975_v56  ;;  %2067 = vmatprep.subr.bf16.mxu0 %v4140_v18  ;;  %v4143_v56 = vld [vmem:[%s5590_s2 + $0x34] ss:$8 sps:$4 sm:$0xff]  }
 0x1e1   : > { %2068 = vmatpush1.bf16.msra.mxu0 %v4138_v20 }
 0x1e2   : > { %2069 = vmatprep.subr.bf16.mxu0 %v4143_v56 }
 0x1e7   : > { %1485 = vmatmul.mubr.bf16.gmra.mrb[32].mxu1 %v4973_v58  ;;  %v4141_v58 = vld [vmem:[%s5590_s2 + $0x30] ss:$8 sps:$4 sm:$0xff]  }
 0x1e8   : > { %1492 = vmatprep.mubr.bf16.mxu1 %v1158_v14  ;;  %2070 = vmatpush1.bf16.msra.mxu0 %v4141_v58  ;;  %v4158_v14 = vld [vmem:[%s5590_s2 + $0x84] ss:$8 sps:$4 sm:$0xff]  }
 0x1e9   : > { %2071 = vmatprep.subr.bf16.mxu0 %v4146_v10 }
 0x1ec   : > { %2072 = vmatpush1.bf16.msra.mxu0 %v4144_v11 }
 0x1ed   : > { %2073 = vmatprep.subr.bf16.mxu0 %v4149_v6 }
 0x1ef   : > { %1493 = vmatmul.mubr.bf16.gmra.mrb[36].mxu1 %v4987_v60  ;;  %v4153_v60 = vld [vmem:[%s5590_s2 + $0x70] ss:$8 sps:$4 sm:$0xff]  }
 0x1f0   : > { %1500 = vmatprep.mubr.bf16.mxu1 %v1160_v43  ;;  %2074 = vmatpush1.bf16.msra.mxu0 %v4147_v49 }
 0x1f1   : > { %2075 = vmatprep.subr.bf16.mxu0 %v4152_v61 }
 0x1f4   : > { %2076 = vmatpush1.bf16.msra.mxu0 %v4150_v12 }
 0x1f5   : > { %2077 = vmatprep.subr.bf16.mxu0 %v4155_v48 }
 0x1f7   : > { %1501 = vmatmul.mubr.bf16.gmra.mrb[40].mxu1 %v1159_v39 }
 0x1f8   : > { %1508 = vmatprep.mubr.bf16.mxu1 %v1162_v7  ;;  %2078 = vmatpush1.bf16.msra.mxu0 %v4153_v60 }
 0x1f9   : > { %2079 = vmatprep.subr.bf16.mxu0 %v4158_v14 }
 0x1fc   : > { %2080 = vmatpush1.bf16.msra.mxu0 %v4156_v13 }
 0x1fd   : > { %2081 = vmatprep.subr.bf16.mxu0 %v4161_v16 }
 0x1ff   : > { %1509 = vmatmul.mubr.bf16.gmra.mrb[44].mxu1 %v1161_v9 }
 0x200   : > { %2082 = vmatpush1.bf16.msra.mxu0 %v4159_v15 }
 0x201   : > { %2083 = vmatprep.subr.bf16.mxu0 %v4164_v17 }
 0x204   : > { %2084 = vmatpush1.bf16.msra.mxu0 %v4162_v19 }
 0x205   : > { %2085 = vmatprep.subr.bf16.mxu0 %v4167_v22 }
 0x208   : > { %2086 = vmatpush1.bf16.msra.mxu0 %v4165_v21 }
 0x209   : > { %2087 = vmatprep.subr.bf16.mxu0 %v4170_v41 }
 0x20c   : > { %2088 = vmatpush1.bf16.msra.mxu0 %v4168_v23 }
 0x20d   : > { %2089 = vmatprep.subr.bf16.mxu0 %v4173_v24 }
 0x210   : > { %2090 = vmatpush1.bf16.msra.mxu0 %v4171_v26 }
 0x211   : > { %2091 = vmatprep.subr.bf16.mxu0 %v4176_v29 }
 0x214   : > { %2092 = vmatpush1.bf16.msra.mxu0 %v4174_v30 }
 0x215   : > { %2093 = vmatprep.subr.bf16.mxu0 %v4179_v52  ;;  %v4252_v52 = vld [vmem:[%s5593_s5 + $0x140] sm:$0xff]  }
 0x216   : > { %3610 = vmatprep.subr.bf16.mxu1 %v4252_v52 }
 0x218   : > { %2094 = vmatpush1.bf16.msra.mxu0 %v4177_v31  ;;  %v4253_v31 = vld [vmem:[%s5593_s5 + $0x100] sm:$0xff]  }
 0x219   : > { %2136 = vmatprep.subr.bf16.mxu0 %v4182_v32  ;;  %v4254_v32 = vld [vmem:[%s5593_s5 + $0x148] sm:$0xff]   ;;  %3611 = vmatpush3.bf16.msra.mxu1 %v4253_v31 }
 0x21a   : > { %3612 = vmatprep.subr.bf16.mxu1 %v4254_v32 }
 0x252   : > { %v3522_v33 = vpop.f32.mrb[0].mxu1 }
 0x253   : > { %v3523_v34 = vpop.f32.mrb[1].mxu1 }
 0x254   : > { %v3524_v35 = vadd.f32 %v3523_v34, %v3522_v33  ;;  %v3525_v38 = vpop.f32.mrb[2].mxu1 }
 0x255   : > { %v3526_v39 = vpop.f32.mrb[3].mxu1 }
 0x256   : > { %v3527_v42 = vadd.f32 %v3526_v39, %v3525_v38 }
 0x262   : > { %v3528_v43 = vpop.f32.mrb[4].mxu1 }
 0x263   : > { %v3529_v46 = vpop.f32.mrb[5].mxu1 }
 0x264   : > { %v3530_v47 = vadd.f32 %v3529_v46, %v3528_v43  ;;  %v3531_v5 = vpop.f32.mrb[6].mxu1 }
 0x265   : > { %v3532_v50 = vpop.f32.mrb[7].mxu1 }
 0x266   : > { %v3533_v45 = vadd.f32 %v3532_v50, %v3531_v5  ;;  %v4256_v50 = vld [vmem:[%s5593_s5 + $0x150] sm:$0xff]  }
 0x272   : > { %v3534_v51 = vpop.f32.mrb[8].mxu1 }
 0x273   : > { %v3535_v44 = vpop.f32.mrb[9].mxu1 }
 0x274   : > { %v5112_v54 = vadd.f32 %v3535_v44, %v3534_v51  ;;  %v3537_v59 = vpop.f32.mrb[10].mxu1 }
 0x275   : > { %v3538_v62 = vpop.f32.mrb[11].mxu1 }
 0x276   : > { %v5114_v63 = vadd.f32 %v3538_v62, %v3537_v59  ;;  %v4257_v59 = vld [vmem:[%s5593_s5 + $0x110] sm:$0xff]  }
 0x282   : > { %v3540_v0 = vpop.f32.mrb[12].mxu1 }
 0x283   : > { %v3541_v1 = vpop.f32.mrb[13].mxu1 }
 0x284   : > { %v5116_v2 = vadd.f32 %v3541_v1, %v3540_v0  ;;  %v3543_v37 = vpop.f32.mrb[14].mxu1 }
 0x285   : > { %v3544_v3 = vpop.f32.mrb[15].mxu1 }
 0x286   : > { %v5118_v36 = vadd.f32 %v3544_v3, %v3543_v37  ;;  %v4183_v3 = vld [vmem:[%s5590_s2 + $0x110] ss:$8 sps:$4 sm:$0xff]  }
 0x292   : > { %v3546_v4 = vpop.f32.mrb[16].mxu1 }
 0x293   : > { %v3547_v8 = vpop.f32.mrb[17].mxu1 }
 0x294   : > { %v5120_v9 = vadd.f32 %v3547_v8, %v3546_v4  ;;  %v3549_v7 = vpop.f32.mrb[18].mxu1 }
 0x295   : > { %v3550_v28 = vpop.f32.mrb[19].mxu1 }
 0x296   : > { %v5122_v53 = vadd.f32 %v3550_v28, %v3549_v7  ;;  %v4188_v28 = vld [vmem:[%s5590_s2 + $0x124] ss:$8 sps:$4 sm:$0xff]  }
 0x2a2   : > { %v3552_v55 = vpop.f32.mrb[20].mxu1 }
 0x2a3   : > { %v3553_v57 = vpop.f32.mrb[21].mxu1 }
 0x2a4   : > { %v5124_v18 = vadd.f32 %v3553_v57, %v3552_v55  ;;  %v3555_v20 = vpop.f32.mrb[22].mxu1  ;;  %v4259_v57 = vld [vmem:[%s5593_s5 + $0x118] sm:$0xff]  }
 0x2a5   : > { %v3556_v58 = vpop.f32.mrb[23].mxu1 }
 0x2a6   : > { %v5126_v56 = vadd.f32 %v3556_v58, %v3555_v20 }
 0x2aa   : > { %v3574_v10 = vpop.f32.mrb[24].mxu1 }
 0x2ab   : > { %v3575_v11 = vpop.f32.mrb[25].mxu1 }
 0x2ac   : > { %v3576_v6 = vadd.f32 %v3575_v11, %v3574_v10  ;;  %v3577_v49 = vpop.f32.mrb[26].mxu1  ;;  %v4260_v11 = vld [vmem:[%s5593_s5 + $0x160] sm:$0xff]  }
 0x2ad   : > { %v3578_v12 = vpop.f32.mrb[27].mxu1 }
 0x2ae   : > { %v1517_v61 = vmax.f32 %v3524_v35, %v3576_v6  ;;  %v3579_v48 = vadd.f32 %v3578_v12, %v3577_v49  ;;  %v4186_v6 = vld [vmem:[%s5590_s2 + $0x120] ss:$8 sps:$4 sm:$0xff]  }
 0x2b0   : > { %v1518_v60 = vmax.f32 %v3527_v42, %v3579_v48  ;;  %v1529_v13 = vmax.f32 %v1517_v61, 0.0  ;;  %v4255_v42 = vld [vmem:[%s5593_s5 + $0x108] sm:$0xff]   ;;  %v4261_v61 = vld [vmem:[%s5593_s5 + $0x120] sm:$0xff]  }
 0x2b1   : > { %3613 = vmatpush3.bf16.msra.mxu1 %v4255_v42 }
 0x2b2   : > { %v1530_v14 = vmax.f32 %v1518_v60, 0.0  ;;  %v3580_v15 = vpop.f32.mrb[28].mxu1  ;;  %3614 = vmatprep.subr.bf16.mxu1 %v4256_v50 }
 0x2b3   : > { %v3581_v16 = vpop.f32.mrb[29].mxu1 }
 0x2b4   : > { %v1541_v17 = vpack.c.bf16 %v1530_v14, %v1529_v13  ;;  %v3582_v19 = vadd.f32 %v3581_v16, %v3580_v15  ;;  %v3583_v21 = vpop.f32.mrb[30].mxu1  ;;  %v4189_v14 = vld [vmem:[%s5590_s2 + $0x130] ss:$8 sps:$4 sm:$0xff]  }
 0x2b5   : > { %v3584_v22 = vpop.f32.mrb[31].mxu1  ;;  %3615 = vmatpush3.bf16.msra.mxu1 %v4257_v59 }
 0x2b6   : > { %v1519_v23 = vmax.f32 %v3530_v47, %v3582_v19  ;;  %v3585_v41 = vadd.f32 %v3584_v22, %v3583_v21  ;;  %v1553_v47 = vrot.slane %v1541_v17, 4  ;;  %v4194_v19 = vld [vmem:[%s5590_s2 + $0x144] ss:$8 sps:$4 sm:$0xff]  }
 0x2b8   : > { %v1520_v24 = vmax.f32 %v3533_v45, %v3585_v41  ;;  %v1531_v26 = vmax.f32 %v1519_v23, 0.0  ;;  %v4180_v45 = vld [vmem:[%s5590_s2 + $0x100] ss:$8 sps:$4 sm:$0xff]  }
 0x2ba   : > { %v1532_v29 = vmax.f32 %v1520_v24, 0.0  ;;  %v3586_v30 = vpop.f32.mrb[32].mxu1  ;;  %v4192_v24 = vld [vmem:[%s5590_s2 + $0x140] ss:$8 sps:$4 sm:$0xff]  }
 0x2bb   : > { %v3587_v33 = vpop.f32.mrb[33].mxu1 }
 0x2bc   : > { %v5137_v34 = vpack.c.bf16 %v1532_v29, %v1531_v26  ;;  %v3588_v35 = vadd.f32 %v3587_v33, %v3586_v30  ;;  %v3589_v38 = vpop.f32.mrb[34].mxu1  ;;  %v4197_v30 = vld [vmem:[%s5590_s2 + $0x154] ss:$8 sps:$4 sm:$0xff]  }
 0x2bd   : > { %v3590_v39 = vpop.f32.mrb[35].mxu1 }
 0x2be   : > { %v1521_v43 = vmax.f32 %v5112_v54, %v3588_v35  ;;  %v3591_v46 = vadd.f32 %v3590_v39, %v3589_v38  ;;  %v1554_v5 = vrot.slane %v5137_v34, 4  ;;  %v4185_v54 = vld [vmem:[%s5590_s2 + $0x114] ss:$8 sps:$4 sm:$0xff]   ;;  %v4200_v39 = vld [vmem:[%s5590_s2 + $0x164] ss:$8 sps:$4 sm:$0xff]  }
 0x2c0   : > { %v1522_v51 = vmax.f32 %v5114_v63, %v3591_v46  ;;  %v1555_v44 = vsel %vm1552_vm6, %v1553_v47, %v1554_v5  ;;  %v1533_v62 = vmax.f32 %v1521_v43, 0.0  ;;  %v4258_v63 = vld [vmem:[%s5593_s5 + $0x158] sm:$0xff]  }
 0x2c1   : > { %2095 = vmatprep.mubr.bf16.mxu0 %v1555_v44  ;;  %3616 = vmatprep.subr.bf16.mxu1 %v4258_v63 }
 0x2c2   : > { %v1534_v0 = vmax.f32 %v1522_v51, 0.0  ;;  %v3592_v1 = vpop.f32.mrb[36].mxu1  ;;  %2096 = vmatmul.mubr.bf16.vlgmr.msra.gmra.mrb[48].mxu0 %v1541_v17  ;;  %3617 = vmatpush3.bf16.msra.mxu1 %v4259_v57  ;;  %v4203_v51 = vld [vmem:[%s5590_s2 + $0x174] ss:$8 sps:$4 sm:$0xff]   ;;  %v4216_v57 = vld [vmem:[%s5590_s2 + $0x1c0] ss:$8 sps:$4 sm:$0xff]  }
 0x2c3   : > { %2137 = vmatpush1.bf16.msra.mxu0 %v4180_v45  ;;  %v3593_v37 = vpop.f32.mrb[37].mxu1  ;;  %3618 = vmatprep.subr.bf16.mxu1 %v4260_v11  ;;  %v4222_v11 = vld [vmem:[%s5590_s2 + $0x1e0] ss:$8 sps:$4 sm:$0xff]  }
 0x2c4   : > { %v5164_v4 = vpack.c.bf16 %v1534_v0, %v1533_v62  ;;  %v3594_v8 = vadd.f32 %v3593_v37, %v3592_v1  ;;  %v3595_v7 = vpop.f32.mrb[38].mxu1  ;;  %2138 = vmatprep.subr.bf16.mxu0 %v4185_v54  ;;  %v4201_v54 = vld [vmem:[%s5590_s2 + $0x170] ss:$8 sps:$4 sm:$0xff]   ;;  %v4204_v0 = vld [vmem:[%s5590_s2 + $0x180] ss:$8 sps:$4 sm:$0xff]  }
 0x2c5   : > { %v3596_v55 = vpop.f32.mrb[39].mxu1  ;;  %v4209_v1 = vld [vmem:[%s5590_s2 + $0x194] ss:$8 sps:$4 sm:$0xff]   ;;  %v4207_v37 = vld [vmem:[%s5590_s2 + $0x190] ss:$8 sps:$4 sm:$0xff]  }
 0x2c6   : > { %v1523_v20 = vmax.f32 %v5116_v2, %v3594_v8  ;;  %v3597_v58 = vadd.f32 %v3596_v55, %v3595_v7  ;;  %v1556_v10 = vrot.slane %v5164_v4, 4  ;;  %v4191_v2 = vld [vmem:[%s5590_s2 + $0x134] ss:$8 sps:$4 sm:$0xff]   ;;  %3619 = vmatpush3.bf16.msra.mxu1 %v4261_v61  ;;  %v4210_v8 = vld [vmem:[%s5590_s2 + $0x1a0] ss:$8 sps:$4 sm:$0xff]  }
 0x2c7   : > { %2139 = vmatpush1.bf16.msra.mxu0 %v4183_v3  ;;  %v4212_v3 = vld [vmem:[%s5590_s2 + $0x1a4] ss:$8 sps:$4 sm:$0xff]   ;;  %v4215_v7 = vld [vmem:[%s5590_s2 + $0x1b4] ss:$8 sps:$4 sm:$0xff]  }
 0x2c8   : > { %v1524_v49 = vmax.f32 %v5118_v36, %v3597_v58  ;;  %v1557_v12 = vsel %vm1552_vm6, %v1554_v5, %v1556_v10  ;;  %2140 = vmatprep.subr.bf16.mxu0 %v4188_v28  ;;  %v1535_v48 = vmax.f32 %v1523_v20, 0.0  ;;  %v4198_v5 = vld [vmem:[%s5590_s2 + $0x160] ss:$8 sps:$4 sm:$0xff]   ;;  %v4213_v28 = vld [vmem:[%s5590_s2 + $0x1b0] ss:$8 sps:$4 sm:$0xff]  }
 0x2c9   : > { %2105 = vmatprep.mubr.bf16.mxu0 %v1557_v12  ;;  %v4218_v55 = vld [vmem:[%s5590_s2 + $0x1c4] ss:$8 sps:$4 sm:$0xff]   ;;  %v4221_v20 = vld [vmem:[%s5590_s2 + $0x1d4] ss:$8 sps:$4 sm:$0xff]   ;;  %v4219_v58 = vld [vmem:[%s5590_s2 + $0x1d0] ss:$8 sps:$4 sm:$0xff]  }
 0x2ca   : > { %v1536_v60 = vmax.f32 %v1524_v49, 0.0  ;;  %v3598_v13 = vpop.f32.mrb[40].mxu1  ;;  %2106 = vmatmul.mubr.bf16.gmra.mrb[52].mxu0 %v5137_v34  ;;  %v4225_v49 = vld [vmem:[%s5590_s2 + $0x1f0] ss:$8 sps:$4 sm:$0xff]   ;;  %v4233_v61 = vld [vmem:[%s5590_s2 + $0x214] ss:$8 sps:$4 sm:$0xff]  }
 0x2cb   : > { %2141 = vmatpush1.bf16.msra.mxu0 %v4186_v6  ;;  %v3599_v36 = vpop.f32.mrb[41].mxu1  ;;  %v4227_v6 = vld [vmem:[%s5590_s2 + $0x1f4] ss:$8 sps:$4 sm:$0xff]  }
 0x2cc   : > { %v5192_v15 = vpack.c.bf16 %v1536_v60, %v1535_v48  ;;  %v3600_v16 = vadd.f32 %v3599_v36, %v3598_v13  ;;  %v3601_v17 = vpop.f32.mrb[42].mxu1  ;;  %2142 = vmatprep.subr.bf16.mxu0 %v4191_v2  ;;  %v4228_v2 = vld [vmem:[%s5590_s2 + $0x200] ss:$8 sps:$4 sm:$0xff]   ;;  %v4231_v48 = vld [vmem:[%s5590_s2 + $0x210] ss:$8 sps:$4 sm:$0xff]  }
 0x2cd   : > { %v3602_v21 = vpop.f32.mrb[43].mxu1  ;;  %v4236_v60 = vld [vmem:[%s5590_s2 + $0x224] ss:$8 sps:$4 sm:$0xff]   ;;  %v4234_v13 = vld [vmem:[%s5590_s2 + $0x220] ss:$8 sps:$4 sm:$0xff]  }
 0x2ce   : > { %v1525_v22 = vmax.f32 %v5120_v9, %v3600_v16  ;;  %v3603_v23 = vadd.f32 %v3602_v21, %v3601_v17  ;;  %v1558_v41 = vrot.slane %v5192_v15, 4  ;;  %v4237_v36 = vld [vmem:[%s5590_s2 + $0x230] ss:$8 sps:$4 sm:$0xff]   ;;  %v4240_v16 = vld [vmem:[%s5590_s2 + $0x240] ss:$8 sps:$4 sm:$0xff]  }
 0x2cf   : > { %2143 = vmatpush1.bf16.msra.mxu0 %v4189_v14  ;;  %v4242_v14 = vld [vmem:[%s5590_s2 + $0x244] ss:$8 sps:$4 sm:$0xff]   ;;  %v4245_v17 = vld [vmem:[%s5590_s2 + $0x254] ss:$8 sps:$4 sm:$0xff]  }
 0x2d0   : > { %v1526_v26 = vmax.f32 %v5122_v53, %v3603_v23  ;;  %v5204_v29 = vsel %vm1552_vm6, %v1556_v10, %v1558_v41  ;;  %2144 = vmatprep.subr.bf16.mxu0 %v4194_v19  ;;  %v1537_v9 = vmax.f32 %v1525_v22, 0.0  ;;  %v4195_v53 = vld [vmem:[%s5590_s2 + $0x150] ss:$8 sps:$4 sm:$0xff]   ;;  %v4224_v10 = vld [vmem:[%s5590_s2 + $0x1e4] ss:$8 sps:$4 sm:$0xff]  }
 0x2d1   : > { %2115 = vmatprep.mubr.bf16.mxu0 %v5204_v29  ;;  %v4243_v19 = vld [vmem:[%s5590_s2 + $0x250] ss:$8 sps:$4 sm:$0xff]   ;;  %v4248_v21 = vld [vmem:[%s5590_s2 + $0x264] ss:$8 sps:$4 sm:$0xff]   ;;  %v4246_v22 = vld [vmem:[%s5590_s2 + $0x260] ss:$8 sps:$4 sm:$0xff]  }
 0x2d2   : > { %v1538_v52 = vmax.f32 %v1526_v26, 0.0  ;;  %v3604_v31 = vpop.f32.mrb[44].mxu1  ;;  %2116 = vmatmul.mubr.bf16.gmra.mrb[56].mxu0 %v5164_v4  ;;  %v4251_v23 = vld [vmem:[%s5590_s2 + $0x274] ss:$8 sps:$4 sm:$0xff]   ;;  %v4262_v26 = vld [vmem:[%s5593_s5 + $0x168] sm:$0xff]  }
 0x2d3   : > { %2145 = vmatpush1.bf16.msra.mxu0 %v4192_v24  ;;  %v3605_v32 = vpop.f32.mrb[45].mxu1  ;;  %v4398_v24 = vmov 0   ;;  %3620 = vmatprep.subr.bf16.mxu1 %v4262_v26  ;;  %v4279_v26 = vld [vmem:[%s5593_s5 + $0x1a8] sm:$0xff]  }
 0x2d4   : > { %v5214_v33 = vpack.c.bf16 %v1538_v52, %v1537_v9  ;;  %v3606_v35 = vadd.f32 %v3605_v32, %v3604_v31  ;;  %v3607_v38 = vpop.f32.mrb[46].mxu1  ;;  %2146 = vmatprep.subr.bf16.mxu0 %v4197_v30  ;;  %v4266_v30 = vld [vmem:[%s5593_s5 + $0x178] sm:$0xff]   ;;  %v4268_v52 = vld [vmem:[%s5593_s5 + $0x1c0] sm:$0xff]  }
 0x2d5   : > { %v3608_v42 = vpop.f32.mrb[47].mxu1  ;;  %v4267_v9 = vld [vmem:[%s5593_s5 + $0x138] sm:$0xff]   ;;  %v3285_v31 = vld [vmem:[%s5594_s6 + $0x1] ss:$8 sm:$0x3] }
 0x2d6   : > { %v1527_v43 = vmax.f32 %v5124_v18, %v3606_v35  ;;  %v3609_v46 = vadd.f32 %v3608_v42, %v3607_v38  ;;  %v1560_v47 = vrot.slane %v5214_v33, 4  ;;  %v1656_v32 = vrot.slane %v3285_v31, %v769_v25 }
 0x2d7   : > { %2147 = vmatpush1.bf16.msra.mxu0 %v4195_v53 }
 0x2d8   : > { %v1528_v50 = vmax.f32 %v5126_v56, %v3609_v46  ;;  %v1561_v45 = vsel %vm1552_vm6, %v1558_v41, %v1560_v47  ;;  %2148 = vmatprep.subr.bf16.mxu0 %v4200_v39  ;;  %v1539_v44 = vmax.f32 %v1527_v43, 0.0  ;;  %v4206_v56 = vld [vmem:[%s5590_s2 + $0x184] ss:$8 sps:$4 sm:$0xff]   ;;  %v4249_v41 = vld [vmem:[%s5590_s2 + $0x270] ss:$8 sps:$4 sm:$0xff]  }
 0x2d9   : > { %2125 = vmatprep.mubr.bf16.mxu0 %v1561_v45 }
 0x2da   : > { %v1540_v18 = vmax.f32 %v1528_v50, 0.0  ;;  %2126 = vmatmul.mubr.bf16.gmra.mrb[60].mxu0 %v5192_v15 }
 0x2db   : > { %2149 = vmatpush1.bf16.msra.mxu0 %v4198_v5  ;;  %2168 = vmatprep.mubr.bf16.mxu0 %v1557_v12  ;;  %v4230_v12 = vld [vmem:[%s5590_s2 + $0x204] ss:$8 sps:$4 sm:$0xff]  }
 0x2dc   : > { %v5233_v59 = vpack.c.bf16 %v1540_v18, %v1539_v44  ;;  %2150 = vmatprep.subr.bf16.mxu0 %v4203_v51 }
 0x2de   : > { %v1567_v62 = vrot.slane %v5233_v59, 4 }
 0x2df   : > { %2151 = vmatpush1.bf16.msra.mxu0 %v4201_v54 }
 0x2e0   : > { %2152 = vmatprep.subr.bf16.mxu0 %v4206_v56  ;;  %v1568_v63 = vsel %vm1552_vm6, %v1560_v47, %v1567_v62 }
 0x2e3   : > { %2153 = vmatpush1.bf16.msra.mxu0 %v4204_v0 }
 0x2e4   : > { %2154 = vmatprep.subr.bf16.mxu0 %v4209_v1 }
 0x2e7   : > { %2155 = vmatpush1.bf16.msra.mxu0 %v4207_v37 }
 0x2e8   : > { %2156 = vmatprep.subr.bf16.mxu0 %v4212_v3  ;;  %v4270_v3 = vld [vmem:[%s5593_s5 + $0x1c8] sm:$0xff]  }
 0x2eb   : > { %2157 = vmatpush1.bf16.msra.mxu0 %v4210_v8 }
 0x2ec   : > { %2158 = vmatprep.subr.bf16.mxu0 %v4215_v7 }
 0x2ef   : > { %2159 = vmatpush1.bf16.msra.mxu0 %v4213_v28 }
 0x2f0   : > { %2160 = vmatprep.subr.bf16.mxu0 %v4218_v55 }
 0x2f3   : > { %2161 = vmatpush1.bf16.msra.mxu0 %v4216_v57 }
 0x2f4   : > { %2162 = vmatprep.subr.bf16.mxu0 %v4221_v20 }
 0x2f7   : > { %2163 = vmatpush1.bf16.msra.mxu0 %v4219_v58  ;;  %v4271_v58 = vld [vmem:[%s5593_s5 + $0x188] sm:$0xff]  }
 0x2f8   : > { %2164 = vmatprep.subr.bf16.mxu0 %v4224_v10 }
 0x2fb   : > { %2165 = vmatpush1.bf16.msra.mxu0 %v4222_v11  ;;  %v4272_v11 = vld [vmem:[%s5593_s5 + $0x1d0] sm:$0xff]  }
 0x2fc   : > { %2166 = vmatprep.subr.bf16.mxu0 %v4227_v6 }
 0x2ff   : > { %2167 = vmatpush1.bf16.msra.mxu0 %v4225_v49 }
 0x300   : > { %2209 = vmatprep.subr.bf16.mxu0 %v4230_v12  ;;  %v4273_v12 = vld [vmem:[%s5593_s5 + $0x190] sm:$0xff]  }
 0x302   : > { %2169 = vmatmul.mubr.bf16.vlgmr.msra.gmra.mrb[48].mxu0 %v5137_v34  ;;  %v4239_v34 = vld [vmem:[%s5590_s2 + $0x234] ss:$8 sps:$4 sm:$0xff]  }
 0x303   : > { %2178 = vmatprep.mubr.bf16.mxu0 %v5204_v29  ;;  %2210 = vmatpush1.bf16.msra.mxu0 %v4228_v2  ;;  %v4263_v29 = vld [vmem:[%s5593_s5 + $0x128] sm:$0xff]  }
 0x304   : > { %2211 = vmatprep.subr.bf16.mxu0 %v4233_v61  ;;  %3621 = vmatpush3.bf16.msra.mxu1 %v4263_v29  ;;  %v4274_v61 = vld [vmem:[%s5593_s5 + $0x1d8] sm:$0xff]   ;;  %v4280_v29 = vld [vmem:[%s5593_s5 + $0x1f0] sm:$0xff]  }
 0x307   : > { %2212 = vmatpush1.bf16.msra.mxu0 %v4231_v48 }
 0x308   : > { %2213 = vmatprep.subr.bf16.mxu0 %v4236_v60 }
 0x30a   : > { %2179 = vmatmul.mubr.bf16.gmra.mrb[52].mxu0 %v5164_v4 }
 0x30b   : > { %2188 = vmatprep.mubr.bf16.mxu0 %v1561_v45  ;;  %2214 = vmatpush1.bf16.msra.mxu0 %v4234_v13 }
 0x30c   : > { %2215 = vmatprep.subr.bf16.mxu0 %v4239_v34 }
 0x30f   : > { %2216 = vmatpush1.bf16.msra.mxu0 %v4237_v36 }
 0x310   : > { %2217 = vmatprep.subr.bf16.mxu0 %v4242_v14 }
 0x312   : > { %2189 = vmatmul.mubr.bf16.gmra.mrb[56].mxu0 %v5192_v15 }
 0x313   : > { %2198 = vmatprep.mubr.bf16.mxu0 %v1568_v63  ;;  %2218 = vmatpush1.bf16.msra.mxu0 %v4240_v16  ;;  %v4269_v63 = vld [vmem:[%s5593_s5 + $0x180] sm:$0xff]   ;;  %v4275_v16 = vld [vmem:[%s5593_s5 + $0x198] sm:$0xff]  }
 0x314   : > { %2219 = vmatprep.subr.bf16.mxu0 %v4245_v17 }
 0x317   : > { %2220 = vmatpush1.bf16.msra.mxu0 %v4243_v19  ;;  %v4276_v19 = vld [vmem:[%s5593_s5 + $0x1e0] sm:$0xff]  }
 0x318   : > { %2221 = vmatprep.subr.bf16.mxu0 %v4248_v21 }
 0x31a   : > { %2199 = vmatmul.mubr.bf16.gmra.mrb[60].mxu0 %v5214_v33 }
 0x31b   : > { %2222 = vmatpush1.bf16.msra.mxu0 %v4246_v22  ;;  %2241 = vmatprep.mubr.bf16.mxu0 %v4398_v24 }
 0x31c   : > { %2223 = vmatprep.subr.bf16.mxu0 %v4251_v23 }
 0x31f   : > { %2224 = vmatpush1.bf16.msra.mxu0 %v4249_v41  ;;  %v4277_v41 = vld [vmem:[%s5593_s5 + $0x1a0] sm:$0xff]  }
 0x322   : > { %2242 = vmatmul.mubr.bf16.vlgmr.msra.gmra.mrb[48].mxu0 %v5164_v4  ;;  %v4264_v4 = vld [vmem:[%s5593_s5 + $0x170] sm:$0xff]  }
 0x323   : > { %2251 = vmatprep.mubr.bf16.mxu0 %v4398_v24  ;;  %3622 = vmatprep.subr.bf16.mxu1 %v4264_v4  ;;  %v4281_v4 = vld [vmem:[%s5593_s5 + $0x1b0] sm:$0xff]  }
 0x32a   : > { %2252 = vmatmul.mubr.bf16.gmra.mrb[52].mxu0 %v5192_v15  ;;  %v4265_v15 = vld [vmem:[%s5593_s5 + $0x130] sm:$0xff]  }
 0x32b   : > { %2261 = vmatprep.mubr.bf16.mxu0 %v4398_v24  ;;  %3623 = vmatpush3.bf16.msra.mxu1 %v4265_v15  ;;  %v4282_v15 = vld [vmem:[%s5593_s5 + $0x1f8] sm:$0xff]  }
 0x32c   : > { %3624 = vmatprep.subr.bf16.mxu1 %v4266_v30  ;;  %v4283_v30 = vld [vmem:[%s5593_s5 + $0x1b8] sm:$0xff]  }
 0x32f   : > { %3625 = vmatpush3.bf16.msra.mxu1 %v4267_v9  ;;  %v4284_v9 = vld [vmem:[%s5591_s3 + $0x40] sm:$0xff]  }
 0x330   : > { %3638 = vmatprep.subr.bf16.mxu1 %v4268_v52  ;;  %v4285_v52 = vld [vmem:[%s5591_s3] sm:$0xff]  }
 0x332   : > { %2262 = vmatmul.mubr.bf16.gmra.mrb[56].mxu0 %v5214_v33  ;;  %v1660_v33 = vrot.slane %v3285_v31, %v773_v27  ;;  %v4286_v31 = vld [vmem:[%s5591_s3 + $0x48] sm:$0xff]  }
 0x333   : > { %2271 = vmatprep.mubr.bf16.mxu0 %v4398_v24  ;;  %v4278_v24 = vld [vmem:[%s5593_s5 + $0x1e8] sm:$0xff]  }
 0x33a   : > { %2272 = vmatmul.mubr.bf16.gmra.mrb[60].mxu0 %v5233_v59 }
 0x3f5   : > { %v2243_v53 = vpop.f32.mrb[48].mxu0 }
 0x3f6   : > { %v2245_v35 = vpop.f32.mrb[49].mxu0  ;;  %v3739_v39 = vadd.f32 %v2243_v53, %v1656_v32  ;;  %v4288_v53 = vld [vmem:[%s5591_s3 + $0x50] sm:$0xff]  }
 0x3f7   : > { %v2247_v38 = vpop.f32.mrb[50].mxu0  ;;  %v3740_v46 = vadd.f32 %v2245_v35, %v1660_v33  ;;  %v4290_v35 = vld [vmem:[%s5591_s3 + $0x58] sm:$0xff]  }
 0x3f8   : > { %v3741_v42 = vadd.f32 %v2247_v38, %v1656_v32  ;;  %v2249_v43 = vpop.f32.mrb[51].mxu0  ;;  %v4291_v38 = vld [vmem:[%s5591_s3 + $0x18] sm:$0xff]  }
 0x3f9   : > { %v3742_v47 = vadd.f32 %v2249_v43, %v1660_v33  ;;  %v4294_v43 = vld [vmem:[%s5591_s3 + $0x68] sm:$0xff]  }
 0x3fa   : > { %v2282_v5 = vmax.f32 %v3739_v39, %v3741_v42  ;;  %v4292_v39 = vld [vmem:[%s5591_s3 + $0x60] sm:$0xff]  }
 0x3fb   : > { %v2283_v50 = vmax.f32 %v3740_v46, %v3742_v47  ;;  %v4293_v42 = vld [vmem:[%s5591_s3 + $0x20] sm:$0xff]   ;;  %v4295_v46 = vld [vmem:[%s5591_s3 + $0x28] sm:$0xff]   ;;  %v4296_v47 = vld [vmem:[%s5591_s3 + $0x70] sm:$0xff]  }
 0x3fd   : > { %v2253_v45 = vpop.f32.mrb[52].mxu0 }
 0x3fe   : > { %v2255_v51 = vpop.f32.mrb[53].mxu0  ;;  %v3743_v18 = vadd.f32 %v2253_v45, %v1656_v32  ;;  %v4299_v45 = vld [vmem:[%s5591_s3 + $0x38] sm:$0xff]  }
 0x3ff   : > { %v2257_v44 = vpop.f32.mrb[54].mxu0  ;;  %v3744_v25 = vadd.f32 %v2255_v51, %v1660_v33  ;;  %v4300_v51 = vld [vmem:[%s5591_s3 + $0xc0] sm:$0xff]  }
 0x400   : > { %v3745_v54 = vadd.f32 %v2257_v44, %v1656_v32  ;;  %v2259_v59 = vpop.f32.mrb[55].mxu0 }
 0x401   : > { %v3746_v56 = vadd.f32 %v2259_v59, %v1660_v33 }
 0x402   : > { %v2284_v62 = vmax.f32 %v3743_v18, %v3745_v54 }
 0x403   : > { %v2285_v40 = vmax.f32 %v3744_v25, %v3746_v56 }
 0x404   : > { %v2356_v27 = vpack.c.bf16 %v2284_v62, %v2282_v5  ;;  %v4297_v5 = vld [vmem:[%s5591_s3 + $0x30] sm:$0xff]  }
 0x405   : > { %v2263_v0 = vpop.f32.mrb[56].mxu0  ;;  %v2357_v1 = vpack.c.bf16 %v2285_v40, %v2283_v50  ;;  %v4298_v50 = vld [vmem:[%s5591_s3 + $0x78] sm:$0xff]  }
 0x406   : > { %v2265_v37 = vpop.f32.mrb[57].mxu0  ;;  %v3747_v7 = vadd.f32 %v2263_v0, %v1656_v32 }
 0x407   : > { %v2267_v8 = vpop.f32.mrb[58].mxu0  ;;  %2488 = vmatprep.mubr.bf16.mxu1 %v2357_v1  ;;  %v3748_v57 = vadd.f32 %v2265_v37, %v1660_v33 }
 0x408   : > { %v3749_v28 = vadd.f32 %v2267_v8, %v1656_v32  ;;  %v2269_v55 = vpop.f32.mrb[59].mxu0  ;;  %2489 = vmatmul.mubr.bf16.vlgmr.msra.gmra.mrb[48].mxu1 %v2356_v27 }
 0x409   : > { %v3750_v20 = vadd.f32 %v2269_v55, %v1660_v33  ;;  %3639 = vmatpush3.bf16.msra.mxu1 %v4269_v63 }
 0x40a   : > { %v2286_v10 = vmax.f32 %v3747_v7, %v3749_v28  ;;  %3640 = vmatprep.subr.bf16.mxu1 %v4270_v3 }
 0x40b   : > { %v2287_v6 = vmax.f32 %v3748_v57, %v3750_v20 }
 0x40d   : > { %3641 = vmatpush3.bf16.msra.mxu1 %v4271_v58  ;;  %v2273_v49 = vpop.f32.mrb[60].mxu0 }
 0x40e   : > { %v2275_v2 = vpop.f32.mrb[61].mxu0  ;;  %3642 = vmatprep.subr.bf16.mxu1 %v4272_v11  ;;  %v3751_v60 = vadd.f32 %v2273_v49, %v1656_v32 }
 0x40f   : > { %v2277_v48 = vpop.f32.mrb[62].mxu0  ;;  %v3752_v36 = vadd.f32 %v2275_v2, %v1660_v33 }
 0x410   : > { %v3753_v13 = vadd.f32 %v2277_v48, %v1656_v32  ;;  %v2279_v34 = vpop.f32.mrb[63].mxu0  ;;  %v4287_v32 = vld [vmem:[%s5591_s3 + $0x8] sm:$0xff]  }
 0x411   : > { %v3754_v14 = vadd.f32 %v2279_v34, %v1660_v33  ;;  %3643 = vmatpush3.bf16.msra.mxu1 %v4273_v12  ;;  %v4289_v33 = vld [vmem:[%s5591_s3 + $0x10] sm:$0xff]   ;;  %v4301_v34 = vld [vmem:[%s5591_s3 + $0x80] sm:$0xff]  }
 0x412   : > { %v2288_v17 = vmax.f32 %v3751_v60, %v3753_v13  ;;  %3644 = vmatprep.subr.bf16.mxu1 %v4274_v61 }
 0x413   : > { %v2289_v21 = vmax.f32 %v3752_v36, %v3754_v14  ;;  %v4302_v36 = vld [vmem:[%s5591_s3 + $0xc8] sm:$0xff]  }
 0x414   : > { %v2358_v22 = vpack.c.bf16 %v2288_v17, %v2286_v10 }
 0x415   : > { %3645 = vmatpush3.bf16.msra.mxu1 %v4275_v16  ;;  %v2359_v23 = vpack.c.bf16 %v2289_v21, %v2287_v6  ;;  %v4304_v21 = vld [vmem:[%s5591_s3 + $0xd0] sm:$0xff]  }
 0x416   : > { %3646 = vmatprep.subr.bf16.mxu1 %v4276_v19  ;;  %v4303_v19 = vld [vmem:[%s5591_s3 + $0x88] sm:$0xff]  }
 0x417   : > { %2496 = vmatprep.mubr.bf16.mxu1 %v2359_v23 }
 0x418   : > { %2497 = vmatmul.mubr.bf16.gmra.mrb[52].mxu1 %v2358_v22 }
 0x419   : > { %3647 = vmatpush3.bf16.msra.mxu1 %v4277_v41  ;;  %2633 = vmatprep.mubr.bf16.mxu1 %v2357_v1  ;;  %v4305_v41 = vld [vmem:[%s5591_s3 + $0x90] sm:$0xff]  }
 0x41a   : > { %3648 = vmatprep.subr.bf16.mxu1 %v4278_v24  ;;  %v4306_v24 = vld [vmem:[%s5591_s3 + $0xd8] sm:$0xff]  }
 0x41d   : > { %3649 = vmatpush3.bf16.msra.mxu1 %v4279_v26  ;;  %v4307_v26 = vld [vmem:[%s5591_s3 + $0x98] sm:$0xff]  }
 0x41e   : > { %3650 = vmatprep.subr.bf16.mxu1 %v4280_v29  ;;  %v4308_v29 = vld [vmem:[%s5591_s3 + $0xe0] sm:$0xff]  }
 0x421   : > { %3651 = vmatpush3.bf16.msra.mxu1 %v4281_v4  ;;  %v4309_v4 = vld [vmem:[%s5591_s3 + $0xa0] sm:$0xff]  }
 0x422   : > { %3652 = vmatprep.subr.bf16.mxu1 %v4282_v15  ;;  %v4310_v15 = vld [vmem:[%s5591_s3 + $0xe8] sm:$0xff]  }
 0x425   : > { %3653 = vmatpush3.bf16.msra.mxu1 %v4283_v30  ;;  %v4311_v30 = vld [vmem:[%s5591_s3 + $0xa8] sm:$0xff]  }
 0x426   : > { %3666 = vmatprep.subr.bf16.mxu1 %v4284_v9  ;;  %v4312_v9 = vld [vmem:[%s5591_s3 + $0xf0] sm:$0xff]  }
 0x428   : > { %2634 = vmatmul.mubr.bf16.vlgmr.msra.gmra.mrb[56].mxu1 %v2356_v27 }
 0x429   : > { %2641 = vmatprep.mubr.bf16.mxu1 %v2359_v23  ;;  %3667 = vmatpush3.bf16.msra.mxu1 %v4285_v52  ;;  %v4313_v52 = vld [vmem:[%s5591_s3 + $0xb0] sm:$0xff]  }
 0x42a   : > { %3668 = vmatprep.subr.bf16.mxu1 %v4286_v31  ;;  %v4314_v31 = vld [vmem:[%s5591_s3 + $0xf8] sm:$0xff]  }
 0x42d   : > { %3669 = vmatpush3.bf16.msra.mxu1 %v4287_v32  ;;  %v4315_v32 = vld [vmem:[%s5591_s3 + $0xb8] sm:$0xff]  }
 0x42e   : > { %3670 = vmatprep.subr.bf16.mxu1 %v4288_v53  ;;  %v4316_v53 = vld [vmem:[%s5592_s4] sm:$0xff]  }
 0x430   : > { %2642 = vmatmul.mubr.bf16.gmra.mrb[60].mxu1 %v2358_v22 }
 0x431   : > { %3671 = vmatpush3.bf16.msra.mxu1 %v4289_v33  ;;  %v4399_v33 = vmov 0.0  }
 0x432   : > { %3672 = vmatprep.subr.bf16.mxu1 %v4290_v35  ;;  %v4317_v35 = vld [vmem:[%s5592_s4 + $0x8] sm:$0xff]  }
 0x435   : > { %3673 = vmatpush3.bf16.msra.mxu1 %v4291_v38  ;;  %v4318_v38 = vld [vmem:[%s5592_s4 + $0x10] sm:$0xff]  }
 0x436   : > { %3674 = vmatprep.subr.bf16.mxu1 %v4292_v39  ;;  %v4319_v39 = vld [vmem:[%s5592_s4 + $0x18] sm:$0xff]  }
 0x439   : > { %3675 = vmatpush3.bf16.msra.mxu1 %v4293_v42  ;;  %v4320_v42 = vld [vmem:[%s5592_s4 + $0x20] sm:$0xff]  }
 0x43a   : > { %3676 = vmatprep.subr.bf16.mxu1 %v4294_v43  ;;  %v4321_v43 = vld [vmem:[%s5592_s4 + $0x28] sm:$0xff]  }
 0x43d   : > { %3677 = vmatpush3.bf16.msra.mxu1 %v4295_v46  ;;  %v4322_v46 = vld [vmem:[%s5592_s4 + $0x30] sm:$0xff]  }
 0x43e   : > { %3678 = vmatprep.subr.bf16.mxu1 %v4296_v47  ;;  %v4323_v47 = vld [vmem:[%s5592_s4 + $0x38] sm:$0xff]  }
 0x441   : > { %3679 = vmatpush3.bf16.msra.mxu1 %v4297_v5 }
 0x442   : > { %3680 = vmatprep.subr.bf16.mxu1 %v4298_v50 }
 0x445   : > { %3681 = vmatpush3.bf16.msra.mxu1 %v4299_v45 }
 0x446   : > { %3688 = vmatprep.subr.bf16.mxu1 %v4300_v51 }
 0x4db   : > { %v3626_v44 = vpop.f32.mrb[48].mxu1 }
 0x4dc   : > { %v3627_v18 = vpop.f32.mrb[49].mxu1 }
 0x4dd   : > { %v3628_v54 = vadd.f32 %v3627_v18, %v3626_v44  ;;  %v3629_v59 = vpop.f32.mrb[50].mxu1  ;;  %v2730_v18 = vld [vmem:[%s5594_s6 + $0x2] ss:$0 sm:$0xff] }
 0x4de   : > { %v3630_v25 = vpop.f32.mrb[51].mxu1 }
 0x4df   : > { %v3631_v56 = vadd.f32 %v3630_v25, %v3629_v59 }
 0x4eb   : > { %v3632_v62 = vpop.f32.mrb[52].mxu1 }
 0x4ec   : > { %v3633_v40 = vpop.f32.mrb[53].mxu1 }
 0x4ed   : > { %v3634_v27 = vadd.f32 %v3633_v40, %v3632_v62  ;;  %v3635_v0 = vpop.f32.mrb[54].mxu1 }
 0x4ee   : > { %v3636_v1 = vpop.f32.mrb[55].mxu1 }
 0x4ef   : > { %v3637_v63 = vadd.f32 %v3636_v1, %v3635_v0 }
 0x4fb   : > { %v3654_v37 = vpop.f32.mrb[56].mxu1 }
 0x4fc   : > { %v3655_v3 = vpop.f32.mrb[57].mxu1 }
 0x4fd   : > { %v3656_v8 = vadd.f32 %v3655_v3, %v3654_v37  ;;  %v3657_v7 = vpop.f32.mrb[58].mxu1 }
 0x4fe   : > { %v3658_v28 = vpop.f32.mrb[59].mxu1 }
 0x4ff   : > { %v2650_v55 = vmax.f32 %v3628_v54, %v3656_v8  ;;  %v3659_v57 = vadd.f32 %v3658_v28, %v3657_v7 }
 0x501   : > { %v2651_v20 = vmax.f32 %v3631_v56, %v3659_v57  ;;  %v2654_v58 = vmax.f32 %v2650_v55, 0.0 }
 0x503   : > { %v2655_v10 = vmax.f32 %v2651_v20, 0.0  ;;  %v3660_v11 = vpop.f32.mrb[60].mxu1 }
 0x504   : > { %v3661_v6 = vpop.f32.mrb[61].mxu1 }
 0x505   : > { %v2658_v49 = vpack.c.bf16 %v2655_v10, %v2654_v58  ;;  %v3662_v12 = vadd.f32 %v3661_v6, %v3660_v11  ;;  %v3663_v2 = vpop.f32.mrb[62].mxu1 }
 0x506   : > { %v3664_v61 = vpop.f32.mrb[63].mxu1 }
 0x507   : > { %v2652_v48 = vmax.f32 %v3634_v27, %v3662_v12  ;;  %v3665_v60 = vadd.f32 %v3664_v61, %v3663_v2  ;;  %v2661_v13 = vrot.slane %v2658_v49, 4 }
 0x509   : > { %v2653_v14 = vmax.f32 %v3637_v63, %v3665_v60  ;;  %2955 = vmatprep.mubr.bf16.mxu1 %v2661_v13  ;;  %v2656_v16 = vmax.f32 %v2652_v48, 0.0  ;;  %v3021_v63 = vld [vmem:[%s5594_s6 + $0x3] ss:$0 sm:$0xff] }
 0x50a   : > { %2956 = vmatmul.mubr.bf16.vlgmr.msra.gmra.mrb[64].mxu1 %v2658_v49 }
 0x50b   : > { %v2657_v17 = vmax.f32 %v2653_v14, 0.0  ;;  %3689 = vmatpush3.bf16.msra.mxu1 %v4301_v34 }
 0x50c   : > { %3690 = vmatprep.subr.bf16.mxu1 %v4302_v36 }
 0x50d   : > { %v2659_v22 = vpack.c.bf16 %v2657_v17, %v2656_v16 }
 0x50f   : > { %3691 = vmatpush3.bf16.msra.mxu1 %v4303_v19  ;;  %v2664_v23 = vrot.slane %v2659_v22, 4 }
 0x510   : > { %3692 = vmatprep.subr.bf16.mxu1 %v4304_v21 }
 0x511   : > { %2995 = vmatprep.mubr.bf16.mxu1 %v2664_v23 }
 0x513   : > { %3693 = vmatpush3.bf16.msra.mxu1 %v4305_v41 }
 0x514   : > { %3694 = vmatprep.subr.bf16.mxu1 %v4306_v24 }
 0x517   : > { %3695 = vmatpush3.bf16.msra.mxu1 %v4307_v26 }
 0x518   : > { %3696 = vmatprep.subr.bf16.mxu1 %v4308_v29 }
 0x51b   : > { %3697 = vmatpush3.bf16.msra.mxu1 %v4309_v4 }
 0x51c   : > { %3698 = vmatprep.subr.bf16.mxu1 %v4310_v15 }
 0x51f   : > { %3699 = vmatpush3.bf16.msra.mxu1 %v4311_v30 }
 0x520   : > { %3700 = vmatprep.subr.bf16.mxu1 %v4312_v9 }
 0x523   : > { %3701 = vmatpush3.bf16.msra.mxu1 %v4313_v52 }
 0x524   : > { %3702 = vmatprep.subr.bf16.mxu1 %v4314_v31 }
 0x527   : > { %3703 = vmatpush3.bf16.msra.mxu1 %v4315_v32 }
 0x528   : > { %3719 = vmatprep.subr.bf16.mxu1 %v4399_v33 }
 0x52a   : > { %2996 = vmatmul.mubr.bf16.vlgmr.msra.gmra.mrb[68].mxu1 %v2659_v22 }
 0x52b   : > { %3720 = vmatpush3.bf16.msra.mxu1 %v4316_v53  ;;  %3735 = vmatprep.mubr.msk.bf16.mxu1 %vm4400_vm7, %v4399_v33 }
 0x52c   : > { %3721 = vmatprep.subr.bf16.mxu1 %v4399_v33 }
 0x52f   : > { %3722 = vmatpush3.bf16.msra.mxu1 %v4317_v35 }
 0x530   : > { %3723 = vmatprep.subr.bf16.mxu1 %v4399_v33 }
 0x533   : > { %3724 = vmatpush3.bf16.msra.mxu1 %v4318_v38 }
 0x534   : > { %3725 = vmatprep.subr.bf16.mxu1 %v4399_v33 }
 0x537   : > { %3726 = vmatpush3.bf16.msra.mxu1 %v4319_v39 }
 0x538   : > { %3727 = vmatprep.subr.bf16.mxu1 %v4399_v33 }
 0x53b   : > { %3728 = vmatpush3.bf16.msra.mxu1 %v4320_v42 }
 0x53c   : > { %3729 = vmatprep.subr.bf16.mxu1 %v4399_v33 }
 0x53f   : > { %3730 = vmatpush3.bf16.msra.mxu1 %v4321_v43 }
 0x540   : > { %3731 = vmatprep.subr.bf16.mxu1 %v4399_v33 }
 0x543   : > { %3732 = vmatpush3.bf16.msra.mxu1 %v4322_v46 }
 0x544   : > { %3733 = vmatprep.subr.bf16.mxu1 %v4399_v33 }
 0x547   : > { %3734 = vmatpush3.bf16.msra.mxu1 %v4323_v47 }
 0x5dd   : > { %v3682_v5 = vpop.f32.mrb[64].mxu1 }
 0x5de   : > { %v3683_v50 = vpop.f32.mrb[65].mxu1 }
 0x5df   : > { %v3684_v45 = vadd.f32 %v3683_v50, %v3682_v5  ;;  %v3685_v51 = vpop.f32.mrb[66].mxu1 }
 0x5e0   : > { %v3686_v44 = vpop.f32.mrb[67].mxu1 }
 0x5e1   : > { %v2958_v25 = vadd.f32 %v3684_v45, %v2730_v18 }
 0x5fd   : > { %v3704_v54 = vpop.f32.mrb[68].mxu1 }
 0x5fe   : > { %v3705_v59 = vpop.f32.mrb[69].mxu1 }
 0x5ff   : > { %v3706_v56 = vadd.f32 %v3705_v59, %v3704_v54  ;;  %v3707_v62 = vpop.f32.mrb[70].mxu1 }
 0x600   : > { %v3708_v40 = vpop.f32.mrb[71].mxu1 }
 0x601   : > { %v2998_v27 = vadd.f32 %v3706_v56, %v2958_v25 }
 0x603   : > { %v3003_v0 = vmax.f32 %v2998_v27, 0.0 }
 0x605   : > { %v3004_v1 = vpack.c.bf16 %v3003_v0, %v3003_v0 }
 0x607   : > { %3736 = vmatmul.mubr.bf16.vlgmr.msra.gmra.mrb[72].mxu1 %v3004_v1 }
 0x6da   : > { %v3104_v37 = vpop.f32.mrb[72].mxu1 }
 0x6db   : > { %v3105_v3 = vadd.f32 %v3104_v37, %v3021_v63  ;;  %v3737_v8 = vpop.f32.mrb[73].mxu1 }
 0x6dc   : > { %v3107_v7 = vpop.f32.mrb[74].mxu1 }
 0x6dd   : > { %3110 = vst [vmem:[%s272_s19] sm:$0xff] %v3105_v3  ;;  %v3738_v28 = vpop.f32.mrb[75].mxu1 }
 0x6de   : > { %4343 = shalt.err (!%p4340_p3)
}
 0x6df   : > { %s4344_s13 = scalar_lea.hbm %s5546_s20, 128  ;;  %s4348_s16 = scalar_lea.hbm %s5595_s7, 256 }
 0x6e0   : > { %p4345_p4 = scmp.ne.s32.totalorder %s5546_s20, %s4344_s13  ;;  %p4349_p9 = scmp.lt.u32.totalorder %s5546_s20, %s5595_s7 }
 0x6e1   : > { %p4350_p10 = scmp.lt.u32.totalorder %s4348_s16, %s4344_s13  ;;  %p4352_p12 = scmp.lt.u32.totalorder %s4344_s13, %s5546_s20 }
 0x6e2   : > { %p4346_p7 = pnand %p4345_p4, %p4480_p5 }
 0x6e3   : > { %p4351_p11 = por %p4350_p10, %p4349_p9 }
 0x6e4   : > { %p4347_p8 = pneg %p4346_p7 }
 0x6e5   : > { %p4353_p13 = por %p4352_p12, %p4351_p11 }
 0x6e7   : > { %p4354_p0 = pnand %p4353_p13, %p4347_p8 }
 0x6e9   : > { %4357 = shalt.err (!%p4354_p0)
}
 0x6ea   : > { %3787 = dma.vmem_to_hbm [thread:$0]  (%p4480_p5), %s5548_s29, 128, %s5546_s20, %s3112_s21  }
 0x6eb PF: > { %p3793_p1 = scmp.ge.s32.totalorder %s4392_s27, 2  ;;  %s3137_s8 = sand.u32 1, %s4380_s24  }
 0x6ec   : > { %s3138_s17 = scalar_lea.sflag [#allocation3], %s3137_s8 }
 0x6ed   : > { %p3790_p2 = pnand %p3793_p1, %p4484_p6 }
 0x6ef   : > { %4375 = dma.done.wait (!%p3790_p2), %s3138_s17, 128  }
 0x6f0   : > { %4377 = vsyncadd (!%p3790_p2), %s3138_s17, 4294967168  ;;  %p17_p3 = scmp.ge.s32.totalorder %s4467_s30, 4   ;;  %s5598_s24 = smov %s4384_s25 }
 0x6f1   : > { %s5599_s25 = smov %s4388_s26  ;;  %s5600_s26 = smov %s4478_s10 }
 0x6f2   : > { %s5601_s27 = smov %s4467_s30  ;;  %19 = sbr.rel (!%p17_p3) target bundleno = 3 (0x3), region = 87 }
 0x6f9   :  { %3143 = vsyncpa [#allocation3], 1 }
 0x6fa   :  { %3145 = vsyncpa [#allocation3 + $0x1], 1 }

</bundles_post_ra>
